<compile_context>
chip_gen: v5e
topology: v5e:2x2
jax: 0.10.0
libtpu: 0.0.40
codegen_flags: <defaults>
</compile_context>

<pallas_src>
import functools
import math

import jax
import jax.numpy as jnp
from jax import lax
from jax.experimental import pallas as pl
from jax.experimental.pallas import tpu as pltpu


# ---------------------------------------------------------------------------
# Phase 1: hoisted input projection  gates_x = x @ W_ih^T + (b_ih + b_hh)
# ---------------------------------------------------------------------------
def _input_proj_kernel(x_ref, w_ref, b_ref, out_ref):
    out_ref[...] = (jnp.dot(x_ref[...], w_ref[...],
                            preferred_element_type=jnp.float32)
                    + b_ref[...])


def _input_projection(x_flat_bf16, w_ih_t, bias):
    """(M, IN) bf16 @ (IN, 4H) bf16 + (1, 4H) f32 -> (M, 4H) f32, M = T*B rows."""
    M, IN = x_flat_bf16.shape
    four_h = w_ih_t.shape[1]
    TM = M if M <= 512 else 256                 # one block for small problems
    M_pad = pl.cdiv(M, TM) * TM
    xp = x_flat_bf16 if M_pad == M else jnp.pad(
        x_flat_bf16, ((0, M_pad - M), (0, 0)))

    out = pl.pallas_call(
        _input_proj_kernel,
        out_shape=jax.ShapeDtypeStruct((M_pad, four_h), jnp.float32),
        grid_spec=pltpu.PrefetchScalarGridSpec(
            num_scalar_prefetch=0,
            grid=(M_pad // TM,),
            in_specs=[
                pl.BlockSpec((TM, IN), lambda i: (i, 0)),       # x rows (streamed)
                pl.BlockSpec((IN, four_h), lambda i: (0, 0)),   # W_ih^T (resident)
                pl.BlockSpec((1, four_h), lambda i: (0, 0)),    # fused bias
            ],
            out_specs=pl.BlockSpec((TM, four_h), lambda i: (i, 0)),
        ),
        compiler_params=pltpu.CompilerParams(
            dimension_semantics=("parallel",)),
    )(xp, w_ih_t, bias)
    return out[:M]


# ---------------------------------------------------------------------------
# Phase 2: serial recurrence (only the h @ W_hh^T part + gate math per step)
# ---------------------------------------------------------------------------
def _sublstm_rec_kernel(gx_ref, h0_ref, c0_ref, whh_ref,
                        hseq_ref, cseq_ref, h_scr, c_scr, *, tt, hidden):
    # Initialize the carried state from (h0, c0) on the first grid step only.
    @pl.when(pl.program_id(0) == 0)
    def _():
        h_scr[...] = h0_ref[...]
        c_scr[...] = c0_ref[...]

    whh = whh_ref[...]   # (H, 4H) bf16, VMEM-resident across all steps

    def step(i, carry):
        h, c = carry                                             # f32 (B, H)
        gates = gx_ref[i] + jnp.dot(h.astype(jnp.bfloat16), whh,
                                    preferred_element_type=jnp.float32)
        gates = jax.nn.sigmoid(gates)                            # (B, 4H) f32
        in_gate     = gates[:, 0 * hidden:1 * hidden]
        forget_gate = gates[:, 1 * hidden:2 * hidden]
        cell_gate   = gates[:, 2 * hidden:3 * hidden]
        out_gate    = gates[:, 3 * hidden:4 * hidden]
        new_c = forget_gate * c + cell_gate - in_gate
        new_h = jax.nn.sigmoid(new_c) - out_gate
        hseq_ref[i] = new_h
        cseq_ref[i] = new_c
        return new_h, new_c

    # Carry h/c in registers across the TT in-block steps (unrolled for LLO).
    h, c = lax.fori_loop(0, tt, step, (h_scr[...], c_scr[...]), unroll=True)
    h_scr[...] = h
    c_scr[...] = c


# ---------------------------------------------------------------------------
# Wrappers
# ---------------------------------------------------------------------------
def prepare_params(w_ih, w_hh, b_ih, b_hh):
    """One-time parameter preparation (init-time path, NOT per forward call)."""
    return dict(
        w_ih_t=jnp.transpose(w_ih).astype(jnp.bfloat16),          # (IN, 4H) bf16
        w_hh_t=jnp.transpose(w_hh).astype(jnp.bfloat16),          # (H, 4H)  bf16
        bias=(b_ih + b_hh).astype(jnp.float32).reshape(1, -1),    # (1, 4H)  f32
    )


def sublstm_sequence(params, x_seq, h0, c0, *, steps_per_block=None):
    """Apply the subLSTM cell over x_seq: (T, B, IN). Returns (h_seq, c_seq): (T, B, H)."""
    T, B, IN = x_seq.shape
    H = h0.shape[1]
    four_h = 4 * H

    # ---- Phase 1: whole-sequence input projection (one batched matmul, T*B rows).
    x_flat = x_seq.reshape(T * B, IN).astype(jnp.bfloat16)        # cast once, outside loop
    gx = _input_projection(x_flat, params["w_ih_t"], params["bias"])
    gx = gx.reshape(T, B, four_h)                                 # (T, B, 4H) f32

    # ---- Phase 2: recurrence, TT steps per grid iteration.
    tt = steps_per_block if steps_per_block is not None else (T if T <= 16 else 8)
    T_pad = pl.cdiv(T, tt) * tt
    if T_pad != T:
        # Trailing padded steps compute garbage state AFTER the last real step;
        # their outputs are sliced off below, so semantics are unaffected.
        gx = jnp.pad(gx, ((0, T_pad - T), (0, 0), (0, 0)))

    kernel = functools.partial(_sublstm_rec_kernel, tt=tt, hidden=H)

    # TODO(synk): for v7x with larger batch, add a leading 'parallel' batch-tile
    # grid axis (recurrence is independent per batch row) to use both TensorCores.
    h_seq, c_seq = pl.pallas_call(
        kernel,
        out_shape=(
            jax.ShapeDtypeStruct((T_pad, B, H), jnp.float32),
            jax.ShapeDtypeStruct((T_pad, B, H), jnp.float32),
        ),
        grid_spec=pltpu.PrefetchScalarGridSpec(
            num_scalar_prefetch=0,
            grid=(T_pad // tt,),
            in_specs=[
                pl.BlockSpec((tt, B, four_h), lambda t: (t, 0, 0)),  # gates_x block
                pl.BlockSpec((B, H), lambda t: (0, 0)),              # h0 (read once)
                pl.BlockSpec((B, H), lambda t: (0, 0)),              # c0 (read once)
                pl.BlockSpec((H, four_h), lambda t: (0, 0)),         # W_hh^T resident
            ],
            out_specs=[
                pl.BlockSpec((tt, B, H), lambda t: (t, 0, 0)),       # h_seq block
                pl.BlockSpec((tt, B, H), lambda t: (t, 0, 0)),       # c_seq block
            ],
            scratch_shapes=[
                pltpu.VMEM((B, H), jnp.float32),                     # h carry
                pltpu.VMEM((B, H), jnp.float32),                     # c carry
            ],
        ),
        compiler_params=pltpu.CompilerParams(
            dimension_semantics=("arbitrary",)),   # time axis carries state -> sequential
    )(gx, h0, c0, params["w_hh_t"])
    return h_seq[:T], c_seq[:T]


def sublstm_cell(params, x, h, c):
    """Single-step cell, matching subLSTM.forward(input, (h, c)) -> (new_h, new_c)."""
    h_seq, c_seq = sublstm_sequence(params, x[None], h, c)
    return h_seq[0], c_seq[0]


# ---------------------------------------------------------------------------
# Pure-JAX reference (PyTorch semantics), optionally with bf16 matmul operands.
# ---------------------------------------------------------------------------
def _reference_sequence(x_seq, h, c, w_ih, w_hh, b_ih, b_hh, cast_bf16):
    hs, cs = [], []
    bias = b_ih + b_hh
    H = h.shape[1]
    for t in range(x_seq.shape[0]):
        x = x_seq[t]
        if cast_bf16:
            gates = (jnp.dot(x.astype(jnp.bfloat16), w_ih.T.astype(jnp.bfloat16),
                             preferred_element_type=jnp.float32)
                     + jnp.dot(h.astype(jnp.bfloat16), w_hh.T.astype(jnp.bfloat16),
                               preferred_element_type=jnp.float32)
                     + bias)
        else:
            gates = x @ w_ih.T + h @ w_hh.T + bias
        gates = jax.nn.sigmoid(gates)
        i, f, z, o = (gates[:, 0:H], gates[:, H:2 * H],
                      gates[:, 2 * H:3 * H], gates[:, 3 * H:4 * H])
        c = f * c + z - i
        h = jax.nn.sigmoid(c) - o
        hs.append(h)
        cs.append(c)
    return jnp.stack(hs), jnp.stack(cs)


if __name__ == "__main__":
    # Shapes consistent with the module defaults (input=784, state=128); short sequence.
    B, IN, H, T = 8, 784, 128, 8

    key = jax.random.PRNGKey(0)
    k = jax.random.split(key, 5)

    stdv = 1.0 / math.sqrt(H)
    w_ih = jax.random.uniform(k[0], (4 * H, IN), jnp.float32, -stdv, stdv)
    w_hh = jax.random.uniform(k[1], (4 * H, H), jnp.float32, -stdv, stdv)
    b_ih = jax.random.uniform(k[2], (4 * H,), jnp.float32, -stdv, stdv)
    b_hh = jax.random.uniform(k[3], (4 * H,), jnp.float32, -stdv, stdv)

    x_seq = jax.random.normal(k[4], (T, B, IN), jnp.float32)
    h0 = jnp.zeros((B, H), jnp.float32)
    c0 = jnp.zeros((B, H), jnp.float32)

    # One-time parameter prep (init-time path, not per call).
    params = prepare_params(w_ih, w_hh, b_ih, b_hh)

    # Hoisted input projection + fused recurrent kernel.
    h_seq, c_seq = sublstm_sequence(params, x_seq, h0, c0)
    jax.block_until_ready((h_seq, c_seq))

    # Check against a mixed-precision reference (same bf16 operands, f32 accumulation).
    ref_h_mp, ref_c_mp = _reference_sequence(
        x_seq, h0, c0, w_ih, w_hh, b_ih, b_hh, cast_bf16=True)
    assert jnp.allclose(h_seq, ref_h_mp, atol=2e-3, rtol=2e-3)
    assert jnp.allclose(c_seq, ref_c_mp, atol=2e-3, rtol=2e-3)

    # Check against the full-f32 PyTorch-semantics reference (looser: bf16 weights).
    ref_h, ref_c = _reference_sequence(
        x_seq, h0, c0, w_ih, w_hh, b_ih, b_hh, cast_bf16=False)
    assert jnp.allclose(h_seq, ref_h, atol=5e-2, rtol=5e-2)

    # Single-step API matches subLSTM.forward(input, state) semantics.
    h1, c1 = sublstm_cell(params, x_seq[0], h0, c0)
    assert jnp.allclose(h1, h_seq[0], atol=1e-5)
    assert jnp.allclose(c1, c_seq[0], atol=1e-5)

    print("KERNEL_OK")
</pallas_src>

<mosaic_0001>
module attributes {stable_mosaic.version = 11 : i64} {
  func.func @_input_proj_kernel(%arg0: i32, %arg1: memref<64x784xbf16, #tpu.memory_space<vmem>>, %arg2: memref<784x512xbf16, #tpu.memory_space<vmem>>, %arg3: memref<1x512xf32, #tpu.memory_space<vmem>>, %arg4: memref<64x512xf32, #tpu.memory_space<vmem>>) attributes {dimension_semantics = [#tpu.dimension_semantics<parallel>], iteration_bounds = array<i64: 1>, scalar_prefetch = 0 : i64, scratch_operands = 0 : i64, tpu.core_type = #tpu.core_type<tc>, window_params = [{transform_indices = @transform_0, window_bounds = array<i64: 64, 784>}, {pipeline_mode = #tpu.pipeline_mode<synchronous>, transform_indices = @transform_1, window_bounds = array<i64: 784, 512>}, {pipeline_mode = #tpu.pipeline_mode<synchronous>, transform_indices = @transform_2, window_bounds = array<i64: 1, 512>}, {transform_indices = @transform_3, window_bounds = array<i64: 64, 512>}]} {
    %c0 = arith.constant 0 : index
    %c0_0 = arith.constant 0 : index
    %0 = vector.load %arg1[%c0, %c0_0] : memref<64x784xbf16, #tpu.memory_space<vmem>>, vector<64x784xbf16>
    %c0_1 = arith.constant 0 : index
    %c0_2 = arith.constant 0 : index
    %1 = vector.load %arg2[%c0_1, %c0_2] : memref<784x512xbf16, #tpu.memory_space<vmem>>, vector<784x512xbf16>
    %cst = arith.constant dense<0.000000e+00> : vector<64x512xf32>
    %2 = tpu.matmul %0, %1, %cst {dimension_numbers = #tpu.dot_dimension_numbers<[1], [0], [0], [1], [0, 0, 1, 1], [], []>} : vector<64x784xbf16>, vector<784x512xbf16>, vector<64x512xf32> -> vector<64x512xf32>
    %c0_3 = arith.constant 0 : index
    %c0_4 = arith.constant 0 : index
    %3 = vector.load %arg3[%c0_3, %c0_4] : memref<1x512xf32, #tpu.memory_space<vmem>>, vector<1x512xf32>
    %4 = vector.broadcast %3 : vector<1x512xf32> to vector<64x512xf32>
    %5 = arith.addf %2, %4 : vector<64x512xf32>
    %c0_5 = arith.constant 0 : index
    %c0_6 = arith.constant 0 : index
    %6 = vector.load %arg4[%c0_5, %c0_6] : memref<64x512xf32, #tpu.memory_space<vmem>>, vector<64x512xf32>
    tpu.vector_store %arg4[%c0_5, %c0_6], %5 {strides = array<i32>} : memref<64x512xf32, #tpu.memory_space<vmem>>, vector<64x512xf32>,
    return
  }
  func.func @transform_0(%arg0: i32) -> (i32, i32) {
    %c0_i32 = arith.constant 0 : i32
    %c0_i32_0 = arith.constant 0 : i32
    return %arg0, %c0_i32 : i32, i32
  }
  func.func @transform_1(%arg0: i32) -> (i32, i32) {
    %c0_i32 = arith.constant 0 : i32
    %c0_i32_0 = arith.constant 0 : i32
    %c0_i32_1 = arith.constant 0 : i32
    return %c0_i32, %c0_i32_0 : i32, i32
  }
  func.func @transform_2(%arg0: i32) -> (i32, i32) {
    %c0_i32 = arith.constant 0 : i32
    %c0_i32_0 = arith.constant 0 : i32
    %c0_i32_1 = arith.constant 0 : i32
    return %c0_i32, %c0_i32_0 : i32, i32
  }
  func.func @transform_3(%arg0: i32) -> (i32, i32) {
    %c0_i32 = arith.constant 0 : i32
    %c0_i32_0 = arith.constant 0 : i32
    return %arg0, %c0_i32 : i32, i32
  }
}

</mosaic_0001>

<bundles_post_ra>
// kernel: tpu_custom_call.1
= control target key start
LH: loop header
LB: loop body
LE: loop exit
PB: predicated region body
PF: predicated region fallthrough
CT: control target
= control target key end

     0   :  { %8 = vsyncpa [#allocation3], 0  ;;  %s4158_s0 = inlined_call_operand.hbm [shape: bf16[64,784], index: 0, kind: input, shape index: {}]   ;;  %s4159_s1 = inlined_call_operand.hbm [shape: bf16[784,512], index: 1, kind: input, shape index: {}]   ;;  %s4160_s2 = inlined_call_operand.hbm [shape: f32[1,512], index: 2, kind: input, shape index: {}]   ;;  %s4161_s3 = inlined_call_operand.hbm [shape: f32[64,512], index: 3, kind: output, shape index: {}]  }
   0x1   :  { %9 = vsyncpa [#allocation6], 0  ;;  %s28_s14 = sshll.u32 %s4159_s1, 4  ;;  %s29_s14 = int_to_ptr.hbm [resolvable:$true] %s28_s14 }
   0x2   :  { %10 = vsyncpa [#allocation4], 0  ;;  %s3545_s15 = smov [#allocation5]   ;;  %s15_s19 = sshll.u32 %s4158_s0, 4  ;;  %s16_s19 = int_to_ptr.hbm [resolvable:$true] %s15_s19 }
   0x3   :  { %s30_s16 = sshll.u32 %s3545_s15, 4  ;;  %s3546_s20 = smov 256   ;;  %s31_s16 = int_to_ptr.vmem [resolvable:$true] %s30_s16 }
   0x4   :  { %s3547_s21 = smov 16   ;;  %s3548_s22 = smov [#allocation2]  }
   0x5   :  { %36 = dma.hbm_to_vmem [thread:$0]  %s29_s14, 25088, %s31_s16, [#allocation6], %s3546_s20, %s3546_s20, %s3547_s21  }
   0x6   :  { %s17_s23 = sshll.u32 %s3548_s22, 4  ;;  %s3549_s24 = smov 448   ;;  %s18_s23 = int_to_ptr.vmem [resolvable:$true] %s17_s23 }
   0x7   :  { %s3550_s25 = smov 28   ;;  %s42_s27 = sshll.u32 %s4160_s2, 4  ;;  %s43_s27 = int_to_ptr.hbm [resolvable:$true] %s42_s27 }
   0x8   :  { %23 = dma.hbm_to_vmem [thread:$0]  %s16_s19, 3584, %s18_s23, [#allocation3], %s3549_s24, %s3549_s24, %s3550_s25  }
   0x9   :  { %s3551_s28 = smov [#allocation7]  }
   0xa   :  { %s44_s29 = sshll.u32 %s3551_s28, 4  ;;  %s45_s29 = int_to_ptr.vmem [resolvable:$true] %s44_s29 }
   0xb   :  { %47 = dma.hbm_to_vmem [thread:$0]  %s43_s27, 64, %s45_s29, [#allocation6]  }
   0xc   :  { %3539 = dma.done.wait [#allocation3], 3584  }
   0xd   :  { %3540 = vsyncadd [#allocation3], 4294963712 }
   0xe   :  { %3541 = dma.done.wait [#allocation6], 25152  }
   0xf   :  { %3542 = vsyncadd [#allocation6], 4294942144  ;;  %v2522_v0 = vld [vmem:[#allocation5 + $0xe0] sm:$0xf]  ;;  %v3266_v1 = vld [vmem:[#allocation5 + $0xec] sm:$0xf0] }
  0x10   :  { %v2650_v2 = vld [vmem:[#allocation5 + $0x1e0] sm:$0xf]  ;;  %v2523_v3 = vor.u32 %v3266_v1, %v2522_v0  ;;  %v3298_v4 = vld [vmem:[#allocation5 + $0x1ec] sm:$0xf0]  ;;  %vm1419_vm0 = vcmask 130048   ;;  %s3552_s0 = smov [#allocation8]  }
  0x11   :  { %v2778_v5 = vld [vmem:[#allocation5 + $0x2e0] sm:$0xf]  ;;  %v3330_v6 = vld [vmem:[#allocation5 + $0x2ec] sm:$0xf0]  ;;  %v2651_v7 = vor.u32 %v3298_v4, %v2650_v2  ;;  %s2280_s2 = sshll.u32 %s3552_s0, 4  ;;  %s2282_s5 = sshll.u32 %s4161_s3, 4  ;;  %s2281_s2 = int_to_ptr.vmem [resolvable:$true] %s2280_s2  ;;  %s2283_s5 = int_to_ptr.hbm [resolvable:$true] %s2282_s5 }
  0x12   :  { %v2779_v8 = vor.u32 %v3330_v6, %v2778_v5  ;;  %v2906_v9 = vld [vmem:[#allocation5 + $0x3e0] sm:$0xf]  ;;  %v3362_v10 = vld [vmem:[#allocation5 + $0x3ec] sm:$0xf0]  ;;  %1432 = vmatpush.bf16.msra.mxu0 %v2523_v3  ;;  %s3553_s6 = smov 512   ;;  %s3554_s7 = smov 32  }
  0x13   :  { %v2506_v11 = vld [vmem:[#allocation5 + $0xc0] sm:$0xf]  ;;  %v2907_v12 = vor.u32 %v3362_v10, %v2906_v9  ;;  %v3262_v13 = vld [vmem:[#allocation5 + $0xcc] sm:$0xf0]  ;;  %1461 = vmatpush.bf16.msra.mxu1 %v2651_v7 }
  0x14   :  { %v2634_v14 = vld [vmem:[#allocation5 + $0x1c0] sm:$0xf]  ;;  %v3294_v15 = vld [vmem:[#allocation5 + $0x1cc] sm:$0xf0]  ;;  %1490 = vmatpush.bf16.msra.mxu2 %v2779_v8  ;;  %v2507_v16 = vor.u32 %v3262_v13, %v2506_v11 }
  0x15   :  { %v2635_v17 = vor.u32 %v3294_v15, %v2634_v14  ;;  %v2762_v18 = vld [vmem:[#allocation5 + $0x2c0] sm:$0xf]  ;;  %v3326_v19 = vld [vmem:[#allocation5 + $0x2cc] sm:$0xf0]  ;;  %1519 = vmatpush.bf16.msra.mxu3 %v2907_v12 }
  0x16   :  { %v2890_v20 = vld [vmem:[#allocation5 + $0x3c0] sm:$0xf]  ;;  %v2763_v21 = vor.u32 %v3326_v19, %v2762_v18  ;;  %v3358_v22 = vld [vmem:[#allocation5 + $0x3cc] sm:$0xf0]  ;;  %1433 = vmatpush.bf16.msra.mxu0 %v2507_v16 }
  0x17   :  { %v2490_v23 = vld [vmem:[#allocation5 + $0xa0] sm:$0xf]  ;;  %v3258_v24 = vld [vmem:[#allocation5 + $0xac] sm:$0xf0]  ;;  %v2891_v25 = vor.u32 %v3358_v22, %v2890_v20  ;;  %1462 = vmatpush.bf16.msra.mxu1 %v2635_v17 }
  0x18   :  { %v2618_v26 = vld [vmem:[#allocation5 + $0x1a0] sm:$0xf]  ;;  %v3290_v27 = vld [vmem:[#allocation5 + $0x1ac] sm:$0xf0]  ;;  %v2491_v29 = vor.u32 %v3258_v24, %v2490_v23  ;;  %1491 = vmatpush.bf16.msra.mxu2 %v2763_v21 }
  0x19   :  { %v2746_v28 = vld [vmem:[#allocation5 + $0x2a0] sm:$0xf]  ;;  %v3322_v30 = vld [vmem:[#allocation5 + $0x2ac] sm:$0xf0]  ;;  %v2619_v33 = vor.u32 %v3290_v27, %v2618_v26  ;;  %1520 = vmatpush.bf16.msra.mxu3 %v2891_v25 }
  0x1a   :  { %v2874_v31 = vld [vmem:[#allocation5 + $0x3a0] sm:$0xf]  ;;  %v3354_v32 = vld [vmem:[#allocation5 + $0x3ac] sm:$0xf0]  ;;  %v2747_v34 = vor.u32 %v3322_v30, %v2746_v28  ;;  %1434 = vmatpush.bf16.msra.mxu0 %v2491_v29  ;;  %v3211_v29 = vld [vmem:[#allocation2 + $0x18] sm:$0xf0] }
  0x1b   :  { %v2474_v35 = vld [vmem:[#allocation5 + $0x80] sm:$0xf]  ;;  %v3254_v36 = vld [vmem:[#allocation5 + $0x8c] sm:$0xf0]  ;;  %v2875_v38 = vor.u32 %v3354_v32, %v2874_v31  ;;  %1463 = vmatpush.bf16.msra.mxu1 %v2619_v33  ;;  %v3208_v30 = vld [vmem:[#allocation2 + $0x4] sm:$0xf] }
  0x1c   :  { %v2602_v37 = vld [vmem:[#allocation5 + $0x180] sm:$0xf]  ;;  %v3286_v39 = vld [vmem:[#allocation5 + $0x18c] sm:$0xf0]  ;;  %v2475_v44 = vor.u32 %v3254_v36, %v2474_v35  ;;  %1492 = vmatpush.bf16.msra.mxu2 %v2747_v34  ;;  %v3264_v35 = vld [vmem:[#allocation5 + $0xe4] sm:$0xf] }
  0x1d   :  { %v2730_v40 = vld [vmem:[#allocation5 + $0x280] sm:$0xf]  ;;  %v3318_v41 = vld [vmem:[#allocation5 + $0x28c] sm:$0xf0]  ;;  %v2603_v45 = vor.u32 %v3286_v39, %v2602_v37  ;;  %1521 = vmatpush.bf16.msra.mxu3 %v2875_v38  ;;  %v2524_v36 = vld [vmem:[#allocation5 + $0xf0] sm:$0xf0] }
  0x1e   :  { %v2858_v42 = vld [vmem:[#allocation5 + $0x380] sm:$0xf]  ;;  %v3350_v43 = vld [vmem:[#allocation5 + $0x38c] sm:$0xf0]  ;;  %v2731_v46 = vor.u32 %v3318_v41, %v2730_v40  ;;  %1435 = vmatpush.bf16.msra.mxu0 %v2475_v44  ;;  %v2306_v39 = vld [vmem:[#allocation2 + $0x8] sm:$0xf] }
  0x1f   :  { %v2458_v47 = vld [vmem:[#allocation5 + $0x60] sm:$0xf]  ;;  %v3250_v48 = vld [vmem:[#allocation5 + $0x6c] sm:$0xf0]  ;;  %v2859_v50 = vor.u32 %v3350_v43, %v2858_v42  ;;  %1464 = vmatpush.bf16.msra.mxu1 %v2603_v45  ;;  %v3212_v40 = vld [vmem:[#allocation2 + $0x20] sm:$0xf0] }
  0x20   :  { %v2586_v49 = vld [vmem:[#allocation5 + $0x160] sm:$0xf]  ;;  %v3282_v51 = vld [vmem:[#allocation5 + $0x16c] sm:$0xf0]  ;;  %v2459_v56 = vor.u32 %v3250_v48, %v2458_v47  ;;  %1493 = vmatpush.bf16.msra.mxu2 %v2731_v46  ;;  %v3209_v41 = vld [vmem:[#allocation2 + $0xc] sm:$0xf]  ;;  %v2527_v48 = vor.u32 %v3264_v35, %v2524_v36 }
  0x21   :  { %v2714_v52 = vld [vmem:[#allocation5 + $0x260] sm:$0xf]  ;;  %v3314_v53 = vld [vmem:[#allocation5 + $0x26c] sm:$0xf0]  ;;  %v2587_v57 = vor.u32 %v3282_v51, %v2586_v49  ;;  %1522 = vmatpush.bf16.msra.mxu3 %v2859_v50  ;;  %v2308_v43 = vld [vmem:[#allocation2 + $0x24] sm:$0xf0] }
  0x22   :  { %v2842_v54 = vld [vmem:[#allocation5 + $0x360] sm:$0xf]  ;;  %v3346_v55 = vld [vmem:[#allocation5 + $0x36c] sm:$0xf0]  ;;  %v2715_v58 = vor.u32 %v3314_v53, %v2714_v52  ;;  %1436 = vmatpush.bf16.msra.mxu0 %v2459_v56  ;;  %v3588_v52 = vor.u32 %v3212_v40, %v2306_v39  ;;  %v3260_v53 = vld [vmem:[#allocation5 + $0xc4] sm:$0xf] }
  0x23   :  { %v2442_v59 = vld [vmem:[#allocation5 + $0x40] sm:$0xf]  ;;  %v3246_v60 = vld [vmem:[#allocation5 + $0x4c] sm:$0xf0]  ;;  %v2843_v62 = vor.u32 %v3346_v55, %v2842_v54  ;;  %1465 = vmatpush.bf16.msra.mxu1 %v2587_v57  ;;  %v2508_v54 = vld [vmem:[#allocation5 + $0xd0] sm:$0xf0]  ;;  %v3590_v55 = vor.u32 %v3209_v41, %v2308_v43 }
  0x24   :  { %v2570_v61 = vld [vmem:[#allocation5 + $0x140] sm:$0xf]  ;;  %v3278_v63 = vld [vmem:[#allocation5 + $0x14c] sm:$0xf0]  ;;  %v2443_v4 = vor.u32 %v3246_v60, %v2442_v59  ;;  %1494 = vmatpush.bf16.msra.mxu2 %v2715_v58  ;;  %v2511_v60 = vor.u32 %v3260_v53, %v2508_v54 }
  0x25   :  { %v2698_v0 = vld [vmem:[#allocation5 + $0x240] sm:$0xf]  ;;  %v3310_v1 = vld [vmem:[#allocation5 + $0x24c] sm:$0xf0]  ;;  %v2571_v5 = vor.u32 %v3278_v63, %v2570_v61  ;;  %1523 = vmatpush.bf16.msra.mxu3 %v2843_v62  ;;  %4195 = vst [vmem:[#allocation13_spill] sm:$0xff] %v3590_v55 }
  0x26   :  { %v2826_v2 = vld [vmem:[#allocation5 + $0x340] sm:$0xf]  ;;  %v3342_v3 = vld [vmem:[#allocation5 + $0x34c] sm:$0xf0]  ;;  %v2699_v6 = vor.u32 %v3310_v1, %v2698_v0  ;;  %1437 = vmatpush.bf16.msra.mxu0 %v2443_v4  ;;  %v3256_v63 = vld [vmem:[#allocation5 + $0xa4] sm:$0xf] }
  0x27   :  { %v2426_v7 = vld [vmem:[#allocation5 + $0x20] sm:$0xf]  ;;  %v3242_v8 = vld [vmem:[#allocation5 + $0x2c] sm:$0xf0]  ;;  %v2827_v10 = vor.u32 %v3342_v3, %v2826_v2  ;;  %1466 = vmatpush.bf16.msra.mxu1 %v2571_v5  ;;  %v2492_v0 = vld [vmem:[#allocation5 + $0xb0] sm:$0xf0] }
  0x28   :  { %v2554_v9 = vld [vmem:[#allocation5 + $0x120] sm:$0xf]  ;;  %v3274_v11 = vld [vmem:[#allocation5 + $0x12c] sm:$0xf0]  ;;  %v2427_v17 = vor.u32 %v3242_v8, %v2426_v7  ;;  %1495 = vmatpush.bf16.msra.mxu2 %v2699_v6  ;;  %v2495_v5 = vor.u32 %v3256_v63, %v2492_v0  ;;  %v3252_v8 = vld [vmem:[#allocation5 + $0x84] sm:$0xf] }
  0x29   :  { %v2682_v12 = vld [vmem:[#allocation5 + $0x220] sm:$0xf]  ;;  %v3306_v13 = vld [vmem:[#allocation5 + $0x22c] sm:$0xf0]  ;;  %v2555_v21 = vor.u32 %v3274_v11, %v2554_v9  ;;  %1524 = vmatpush.bf16.msra.mxu3 %v2827_v10  ;;  %v2476_v9 = vld [vmem:[#allocation5 + $0x90] sm:$0xf0] }
  0x2a   :  { %v2810_v14 = vld [vmem:[#allocation5 + $0x320] sm:$0xf]  ;;  %v3338_v15 = vld [vmem:[#allocation5 + $0x32c] sm:$0xf0]  ;;  %v2683_v22 = vor.u32 %v3306_v13, %v2682_v12  ;;  %1438 = vmatpush.bf16.msra.mxu0 %v2427_v17  ;;  %v2326_v11 = vld [vmem:[#allocation2 + $0x38] sm:$0xf]  ;;  %v2479_v17 = vor.u32 %v3252_v8, %v2476_v9 }
  0x2b   :  { %v2410_v16 = vld [vmem:[#allocation5] sm:$0xf]  ;;  %v3238_v18 = vld [vmem:[#allocation5 + $0xc] sm:$0xf0]  ;;  %v2811_v26 = vor.u32 %v3338_v15, %v2810_v14  ;;  %1467 = vmatpush.bf16.msra.mxu1 %v2555_v21  ;;  %v3218_v12 = vld [vmem:[#allocation2 + $0x50] sm:$0xf0] }
  0x2c   :  { %v2538_v19 = vld [vmem:[#allocation5 + $0x100] sm:$0xf]  ;;  %v3270_v20 = vld [vmem:[#allocation5 + $0x10c] sm:$0xf0]  ;;  %v2411_v33 = vor.u32 %v3238_v18, %v2410_v16  ;;  %1496 = vmatpush.bf16.msra.mxu2 %v2683_v22  ;;  %v3215_v16 = vld [vmem:[#allocation2 + $0x3c] sm:$0xf] }
  0x2d   :  { %v2666_v23 = vld [vmem:[#allocation5 + $0x200] sm:$0xf]  ;;  %v3302_v24 = vld [vmem:[#allocation5 + $0x20c] sm:$0xf0]  ;;  %v2539_v37 = vor.u32 %v3270_v20, %v2538_v19  ;;  %1525 = vmatpush.bf16.msra.mxu3 %v2811_v26  ;;  %v2328_v20 = vld [vmem:[#allocation2 + $0x54] sm:$0xf0] }
  0x2e   :  { %v2794_v25 = vld [vmem:[#allocation5 + $0x300] sm:$0xf]  ;;  %v3334_v27 = vld [vmem:[#allocation5 + $0x30c] sm:$0xf0]  ;;  %v2667_v38 = vor.u32 %v3302_v24, %v2666_v23  ;;  %1439 = vmatpush.bf16.msra.mxu0 %v2411_v33  ;;  %v3248_v21 = vld [vmem:[#allocation5 + $0x64] sm:$0xf]  ;;  %v3598_v35 = vor.u32 %v3215_v16, %v2328_v20 }
  0x2f   :  { %v2298_v28 = vld [vmem:[#allocation2] sm:$0xf]  ;;  %v3430_v32 = vld [vmem:[#allocation5 + $0x60c] sm:$0xf0]  ;;  %v2795_v42 = vor.u32 %v3334_v27, %v2794_v25  ;;  %1468 = vmatpush.bf16.msra.mxu1 %v2539_v37  ;;  %v2460_v22 = vld [vmem:[#allocation5 + $0x70] sm:$0xf0] }
  0x30   :  { %v3178_v31 = vld [vmem:[#allocation5 + $0x600] sm:$0xf]  ;;  %v3394_v46 = vld [vmem:[#allocation5 + $0x4ec] sm:$0xf0]  ;;  %v3584_v47 = vor.u32 %v3211_v29, %v2298_v28  ;;  %1497 = vmatpush.bf16.msra.mxu2 %v2667_v38  ;;  %v3219_v24 = vld [vmem:[#allocation2 + $0x58] sm:$0xf0] }
  0x31   :  { %v2300_v34 = vld [vmem:[#allocation2 + $0x1c] sm:$0xf0]  ;;  %v3179_v44 = vor.u32 %v3430_v32, %v3178_v31  ;;  %v3426_v50 = vld [vmem:[#allocation5 + $0x5ec] sm:$0xf0]  ;;  %1526 = vmatpush.bf16.msra.mxu3 %v2795_v42  ;;  %v3216_v25 = vld [vmem:[#allocation2 + $0x44] sm:$0xf]  ;;  %v3596_v31 = vor.u32 %v3218_v12, %v2326_v11  ;;  %v2463_v32 = vor.u32 %v3248_v21, %v2460_v22 }
  0x32   :  { %v3034_v45 = vld [vmem:[#allocation5 + $0x4e0] sm:$0xf]  ;;  %v3586_v51 = vor.u32 %v3208_v30, %v2300_v34  ;;  %v3390_v59 = vld [vmem:[#allocation5 + $0x4cc] sm:$0xf0]  ;;  %1440 = vmatmul.bf16.vlgmr.msra.gmra.mxu0 %v3584_v47  ;;  %v3244_v37 = vld [vmem:[#allocation5 + $0x44] sm:$0xf] }
  0x33   :  { %v3162_v49 = vld [vmem:[#allocation5 + $0x5e0] sm:$0xf]  ;;  %v3035_v56 = vor.u32 %v3394_v46, %v3034_v45  ;;  %v3422_v62 = vld [vmem:[#allocation5 + $0x5cc] sm:$0xf0]  ;;  %1498 = vmatmul.bf16.vlgmr.msra.gmra.mxu2 %v3588_v52  ;;  %v2444_v38 = vld [vmem:[#allocation5 + $0x50] sm:$0xf0] }
  0x34   :  { %4194 = vst [vmem:[#allocation12_spill] sm:$0xff] %v3586_v51  ;;  %1613 = vmatpush.bf16.msrb.mxu2 %v3179_v44  ;;  %v3163_v57 = vor.u32 %v3426_v50, %v3162_v49  ;;  %v3018_v58 = vld [vmem:[#allocation5 + $0x4c0] sm:$0xf]  ;;  %1469 = vmatmul.bf16.vlgmr.msra.gmra.mxu1 %v3586_v51  ;;  %v3386_v4 = vld [vmem:[#allocation5 + $0x4ac] sm:$0xf0]  ;;  %v2447_v44 = vor.u32 %v3244_v37, %v2444_v38 }
  0x35   :  { %1635 = vmatpush.bf16.msrb.mxu3 %v2527_v48  ;;  %v3146_v61 = vld [vmem:[#allocation5 + $0x5c0] sm:$0xf]  ;;  %1548 = vmatpush.bf16.msrb.mxu0 %v3035_v56  ;;  %v3019_v1 = vor.u32 %v3390_v59, %v3018_v58  ;;  %v3418_v7 = vld [vmem:[#allocation5 + $0x5ac] sm:$0xf0]  ;;  %v3240_v49 = vld [vmem:[#allocation5 + $0x24] sm:$0xf] }
  0x36   :  { %1527 = vmatmul.bf16.vlgmr.msra.gmra.mxu3 %v3590_v55  ;;  %1577 = vmatpush.bf16.msrb.mxu1 %v3163_v57  ;;  %v3147_v2 = vor.u32 %v3422_v62, %v3146_v61  ;;  %v3002_v3 = vld [vmem:[#allocation5 + $0x4a0] sm:$0xf]  ;;  %v3382_v15 = vld [vmem:[#allocation5 + $0x48c] sm:$0xf0]  ;;  %v2428_v56 = vld [vmem:[#allocation5 + $0x30] sm:$0xf0] }
  0x37   :  { %v3130_v6 = vld [vmem:[#allocation5 + $0x5a0] sm:$0xf]  ;;  %v3003_v10 = vor.u32 %v3386_v4, %v3002_v3  ;;  %v3414_v19 = vld [vmem:[#allocation5 + $0x58c] sm:$0xf0]  ;;  %v2431_v57 = vor.u32 %v3240_v49, %v2428_v56  ;;  %v2412_v61 = vld [vmem:[#allocation5 + $0x10] sm:$0xf0] }
  0x38   :  { %v3131_v13 = vor.u32 %v3418_v7, %v3130_v6  ;;  %v2986_v14 = vld [vmem:[#allocation5 + $0x480] sm:$0xf]  ;;  %v3378_v30 = vld [vmem:[#allocation5 + $0x46c] sm:$0xf0]  ;;  %v3225_v6 = vld [vmem:[#allocation2 + $0x88] sm:$0xf0] }
  0x39   :  { %1636 = vmatpush.bf16.msrb.mxu3 %v2511_v60  ;;  %1549 = vmatpush.bf16.msrb.mxu0 %v3019_v1  ;;  %v3114_v18 = vld [vmem:[#allocation5 + $0x580] sm:$0xf]  ;;  %v2987_v26 = vor.u32 %v3382_v15, %v2986_v14  ;;  %v3410_v34 = vld [vmem:[#allocation5 + $0x56c] sm:$0xf0]  ;;  %v3236_v60 = vld [vmem:[#allocation5 + $0x4] sm:$0xf] }
  0x3a   :  { %1578 = vmatpush.bf16.msrb.mxu1 %v3147_v2  ;;  %v2334_v23 = vld [vmem:[#allocation2 + $0x40] sm:$0xf]  ;;  %v3115_v28 = vor.u32 %v3414_v19, %v3114_v18  ;;  %v3374_v43 = vld [vmem:[#allocation5 + $0x44c] sm:$0xf0]  ;;  %v2415_v2 = vor.u32 %v3236_v60, %v2412_v61  ;;  %v3222_v7 = vld [vmem:[#allocation2 + $0x74] sm:$0xf] }
  0x3b   :  { %v2336_v27 = vld [vmem:[#allocation2 + $0x5c] sm:$0xf0]  ;;  %v3600_v36 = vor.u32 %v3219_v24, %v2334_v23  ;;  %v3406_v46 = vld [vmem:[#allocation5 + $0x54c] sm:$0xf0]  ;;  %v2362_v9 = vld [vmem:[#allocation2 + $0x78] sm:$0xf] }
  0x3c   :  { %v2970_v29 = vld [vmem:[#allocation5 + $0x460] sm:$0xf]  ;;  %v3602_v39 = vor.u32 %v3216_v25, %v2336_v27  ;;  %v3370_v54 = vld [vmem:[#allocation5 + $0x42c] sm:$0xf0]  ;;  %v3223_v12 = vld [vmem:[#allocation2 + $0x7c] sm:$0xf] }
  0x3d   :  { %1637 = vmatpush.bf16.msrb.mxu3 %v2495_v5  ;;  %1550 = vmatpush.bf16.msrb.mxu0 %v3003_v10  ;;  %v3098_v33 = vld [vmem:[#allocation5 + $0x560] sm:$0xf]  ;;  %4196 = vst [vmem:[#allocation14_spill] sm:$0xff] %v3600_v36  ;;  %v2971_v40 = vor.u32 %v3378_v30, %v2970_v29  ;;  %v3402_v59 = vld [vmem:[#allocation5 + $0x52c] sm:$0xf0] }
  0x3e   :  { %1579 = vmatpush.bf16.msrb.mxu1 %v3131_v13  ;;  %4197 = vst [vmem:[#allocation15_spill] sm:$0xff] %v3602_v39  ;;  %v3099_v41 = vor.u32 %v3410_v34, %v3098_v33  ;;  %v2954_v42 = vld [vmem:[#allocation5 + $0x440] sm:$0xf]  ;;  %v3366_v1 = vld [vmem:[#allocation5 + $0x40c] sm:$0xf0] }
  0x3f   :  { %v3082_v45 = vld [vmem:[#allocation5 + $0x540] sm:$0xf]  ;;  %v2955_v48 = vor.u32 %v3374_v43, %v2954_v42  ;;  %v3398_v4 = vld [vmem:[#allocation5 + $0x50c] sm:$0xf0]  ;;  %v3226_v10 = vld [vmem:[#allocation2 + $0x90] sm:$0xf0] }
  0x40   :  { %v3083_v50 = vor.u32 %v3406_v46, %v3082_v45  ;;  %v2938_v53 = vld [vmem:[#allocation5 + $0x420] sm:$0xf]  ;;  %v2354_v5 = vld [vmem:[#allocation2 + $0x70] sm:$0xf]  ;;  %v2364_v13 = vld [vmem:[#allocation2 + $0x94] sm:$0xf0] }
  0x41   :  { %1638 = vmatpush.bf16.msrb.mxu3 %v2479_v17  ;;  %1551 = vmatpush.bf16.msrb.mxu0 %v2987_v26  ;;  %v3066_v58 = vld [vmem:[#allocation5 + $0x520] sm:$0xf]  ;;  %v2939_v62 = vor.u32 %v3370_v54, %v2938_v53  ;;  %v2356_v8 = vld [vmem:[#allocation2 + $0x8c] sm:$0xf0]  ;;  %v3608_v15 = vor.u32 %v3225_v6, %v2354_v5  ;;  %v3612_v17 = vor.u32 %v3226_v10, %v2362_v9  ;;  %v3360_v19 = vld [vmem:[#allocation5 + $0x3e4] sm:$0xf] }
  0x42   :  { %1580 = vmatpush.bf16.msrb.mxu1 %v3115_v28  ;;  %1445 = vmatmul.bf16.gmra.mxu0 %v3596_v31  ;;  %v3067_v63 = vor.u32 %v3402_v59, %v3066_v58  ;;  %v2922_v0 = vld [vmem:[#allocation5 + $0x400] sm:$0xf]  ;;  %v3610_v16 = vor.u32 %v3222_v7, %v2356_v8  ;;  %v3614_v18 = vor.u32 %v3223_v12, %v2364_v13  ;;  %v2908_v20 = vld [vmem:[#allocation5 + $0x3f0] sm:$0xf0]  ;;  %v3296_v21 = vld [vmem:[#allocation5 + $0x1e4] sm:$0xf] }
  0x43   :  { %1503 = vmatmul.bf16.gmra.mxu2 %v3600_v36  ;;  %v3050_v3 = vld [vmem:[#allocation5 + $0x500] sm:$0xf]  ;;  %v2923_v11 = vor.u32 %v3366_v1, %v2922_v0  ;;  %4198 = vst [vmem:[#allocation16_spill] sm:$0xff] %v3612_v17  ;;  %v2911_v22 = vor.u32 %v3360_v19, %v2908_v20  ;;  %v2652_v23 = vld [vmem:[#allocation5 + $0x1f0] sm:$0xf0] }
  0x44   :  { %1474 = vmatmul.bf16.gmra.mxu1 %v3598_v35  ;;  %v3051_v14 = vor.u32 %v3398_v4, %v3050_v3  ;;  %4199 = vst [vmem:[#allocation17_spill] sm:$0xff] %v3614_v18  ;;  %v3392_v24 = vld [vmem:[#allocation5 + $0x4e4] sm:$0xf]  ;;  %v3036_v25 = vld [vmem:[#allocation5 + $0x4f0] sm:$0xf0]  ;;  %v2655_v26 = vor.u32 %v3296_v21, %v2652_v23 }
  0x45   :  { %1639 = vmatpush.bf16.msrb.mxu3 %v2463_v32  ;;  %1552 = vmatpush.bf16.msrb.mxu0 %v2971_v40  ;;  %v3039_v27 = vor.u32 %v3392_v24, %v3036_v25  ;;  %v3328_v28 = vld [vmem:[#allocation5 + $0x2e4] sm:$0xf]  ;;  %v2780_v29 = vld [vmem:[#allocation5 + $0x2f0] sm:$0xf0]  ;;  %v2384_v53 = vld [vmem:[#allocation2 + $0xc4] sm:$0xf0] }
  0x46   :  { %1532 = vmatmul.bf16.gmra.mxu3 %v3602_v39  ;;  %1581 = vmatpush.bf16.msrb.mxu1 %v3099_v41  ;;  %v3356_v30 = vld [vmem:[#allocation5 + $0x3c4] sm:$0xf]  ;;  %v2783_v32 = vor.u32 %v3328_v28, %v2780_v29  ;;  %v2892_v33 = vld [vmem:[#allocation5 + $0x3d0] sm:$0xf0]  ;;  %v2390_v54 = vld [vmem:[#allocation2 + $0xb0] sm:$0xf] }
  0x47   :  { %1722 = vmatpush.bf16.msra.mxu2 %v2911_v22  ;;  %v3292_v34 = vld [vmem:[#allocation5 + $0x1c4] sm:$0xf]  ;;  %v2636_v37 = vld [vmem:[#allocation5 + $0x1d0] sm:$0xf0]  ;;  %v2895_v38 = vor.u32 %v3356_v30, %v2892_v33  ;;  %v3233_v56 = vld [vmem:[#allocation2 + $0xc8] sm:$0xf0] }
  0x48   :  { %v2639_v40 = vor.u32 %v3292_v34, %v2636_v37  ;;  %v3388_v41 = vld [vmem:[#allocation5 + $0x4c4] sm:$0xf]  ;;  %v3020_v42 = vld [vmem:[#allocation5 + $0x4d0] sm:$0xf0]  ;;  %v2392_v58 = vld [vmem:[#allocation2 + $0xcc] sm:$0xf0]  ;;  %v3624_v61 = vor.u32 %v3233_v56, %v2390_v54 }
  0x49   :  { %1640 = vmatpush.bf16.msrb.mxu3 %v2447_v44  ;;  %1553 = vmatpush.bf16.msrb.mxu0 %v2955_v48  ;;  %v3324_v43 = vld [vmem:[#allocation5 + $0x2c4] sm:$0xf]  ;;  %v3023_v44 = vor.u32 %v3388_v41, %v3020_v42  ;;  %v2764_v45 = vld [vmem:[#allocation5 + $0x2d0] sm:$0xf0]  ;;  %v2382_v48 = vld [vmem:[#allocation2 + $0xa8] sm:$0xf] }
  0x4a   :  { %1582 = vmatpush.bf16.msrb.mxu1 %v3083_v50  ;;  %v2767_v46 = vor.u32 %v3324_v43, %v2764_v45  ;;  %v3232_v49 = vld [vmem:[#allocation2 + $0xc0] sm:$0xf0]  ;;  %v3229_v50 = vld [vmem:[#allocation2 + $0xac] sm:$0xf]  ;;  %4202 = vst [vmem:[#allocation20_spill] sm:$0xff] %v3624_v61 }
  0x4b   :  { %1723 = vmatpush.bf16.msra.mxu2 %v2895_v38  ;;  %v3620_v59 = vor.u32 %v3232_v49, %v2382_v48  ;;  %v3622_v60 = vor.u32 %v3229_v50, %v2384_v53  ;;  %v2876_v0 = vld [vmem:[#allocation5 + $0x3b0] sm:$0xf0]  ;;  %v3288_v1 = vld [vmem:[#allocation5 + $0x1a4] sm:$0xf]  ;;  %v3213_v28 = vld [vmem:[#allocation2 + $0x28] sm:$0xf0] }
  0x4c   :  { %v2620_v3 = vld [vmem:[#allocation5 + $0x1b0] sm:$0xf0]  ;;  %v3384_v4 = vld [vmem:[#allocation5 + $0x4a4] sm:$0xf]  ;;  %v2316_v30 = vld [vmem:[#allocation2 + $0x2c] sm:$0xf0] }
  0x4d   :  { %1641 = vmatpush.bf16.msrb.mxu3 %v2431_v57  ;;  %1554 = vmatpush.bf16.msrb.mxu0 %v2939_v62  ;;  %v3230_v57 = vld [vmem:[#allocation2 + $0xb4] sm:$0xf]  ;;  %4200 = vst [vmem:[#allocation18_spill] sm:$0xff] %v3620_v59  ;;  %v2623_v6 = vor.u32 %v3288_v1, %v2620_v3  ;;  %v3320_v8 = vld [vmem:[#allocation5 + $0x2a4] sm:$0xf] }
  0x4e   :  { %1583 = vmatpush.bf16.msrb.mxu1 %v3067_v63  ;;  %4201 = vst [vmem:[#allocation19_spill] sm:$0xff] %v3622_v60  ;;  %v3626_v62 = vor.u32 %v3230_v57, %v2392_v58  ;;  %v3352_v63 = vld [vmem:[#allocation5 + $0x3a4] sm:$0xf]  ;;  %v3004_v5 = vld [vmem:[#allocation5 + $0x4b0] sm:$0xf0] }
  0x4f   :  { %v3007_v7 = vor.u32 %v3384_v4, %v3004_v5  ;;  %v2748_v9 = vld [vmem:[#allocation5 + $0x2b0] sm:$0xf0]  ;;  %v3348_v10 = vld [vmem:[#allocation5 + $0x384] sm:$0xf] }
  0x50   :  { %4203 = vst [vmem:[#allocation21_spill] sm:$0xff] %v3626_v62  ;;  %v2860_v12 = vld [vmem:[#allocation5 + $0x390] sm:$0xf0]  ;;  %v3284_v13 = vld [vmem:[#allocation5 + $0x184] sm:$0xf] }
  0x51   :  { %1642 = vmatpush.bf16.msrb.mxu3 %v2415_v2  ;;  %1555 = vmatpush.bf16.msrb.mxu0 %v2923_v11  ;;  %v2879_v2 = vor.u32 %v3352_v63, %v2876_v0  ;;  %v2751_v11 = vor.u32 %v3320_v8, %v2748_v9  ;;  %v2863_v19 = vor.u32 %v3348_v10, %v2860_v12  ;;  %v3380_v21 = vld [vmem:[#allocation5 + $0x484] sm:$0xf]  ;;  %v2988_v22 = vld [vmem:[#allocation5 + $0x490] sm:$0xf0]  ;;  %v2342_v8 = vld [vmem:[#allocation2 + $0x48] sm:$0xf] }
  0x52   :  { %1584 = vmatpush.bf16.msrb.mxu1 %v3051_v14  ;;  %1450 = vmatmul.bf16.gmra.mxu0 %v3608_v15  ;;  %v2604_v14 = vld [vmem:[#allocation5 + $0x190] sm:$0xf0]  ;;  %v3316_v23 = vld [vmem:[#allocation5 + $0x284] sm:$0xf]  ;;  %v2991_v24 = vor.u32 %v3380_v21, %v2988_v22  ;;  %v3217_v10 = vld [vmem:[#allocation2 + $0x4c] sm:$0xf] }
  0x53   :  { %1508 = vmatmul.bf16.gmra.mxu2 %v3612_v17  ;;  %v2607_v20 = vor.u32 %v3284_v13, %v2604_v14  ;;  %v2732_v25 = vld [vmem:[#allocation5 + $0x290] sm:$0xf0]  ;;  %v3280_v42 = vld [vmem:[#allocation5 + $0x164] sm:$0xf]  ;;  %v2350_v12 = vld [vmem:[#allocation2 + $0x50] sm:$0xf] }
  0x54   :  { %1479 = vmatmul.bf16.gmra.mxu1 %v3610_v16  ;;  %1724 = vmatpush.bf16.msra.mxu2 %v2879_v2  ;;  %v3210_v29 = vld [vmem:[#allocation2 + $0x14] sm:$0xf]  ;;  %v3376_v45 = vld [vmem:[#allocation5 + $0x464] sm:$0xf]  ;;  %v3221_v13 = vld [vmem:[#allocation2 + $0x68] sm:$0xf0] }
  0x55   :  { %1664 = vmatpush.bf16.msra.mxu0 %v2655_v26  ;;  %1751 = vmatpush.bf16.msra.mxu3 %v3039_v27  ;;  %v2735_v26 = vor.u32 %v3316_v23, %v2732_v25  ;;  %v2314_v27 = vld [vmem:[#allocation2 + $0x10] sm:$0xf]  ;;  %v3214_v33 = vld [vmem:[#allocation2 + $0x30] sm:$0xf0]  ;;  %v3634_v37 = vor.u32 %v3210_v29, %v2316_v30  ;;  %v3312_v50 = vld [vmem:[#allocation5 + $0x264] sm:$0xf] }
  0x56   :  { %1537 = vmatmul.bf16.gmra.mxu3 %v3614_v18  ;;  %1693 = vmatpush.bf16.msra.mxu1 %v2783_v32  ;;  %v2322_v32 = vld [vmem:[#allocation2 + $0x18] sm:$0xf]  ;;  %v3632_v34 = vor.u32 %v3213_v28, %v2314_v27  ;;  %v2844_v41 = vld [vmem:[#allocation5 + $0x370] sm:$0xf0]  ;;  %v3340_v54 = vld [vmem:[#allocation5 + $0x344] sm:$0xf] }
  0x57   :  { %4205 = vst [vmem:[#allocation23_spill] sm:$0xff] %v3634_v37  ;;  %v3636_v38 = vor.u32 %v3214_v33, %v2322_v32  ;;  %v2716_v53 = vld [vmem:[#allocation5 + $0x270] sm:$0xf0]  ;;  %v3276_v58 = vld [vmem:[#allocation5 + $0x144] sm:$0xf] }
  0x58   :  { %1725 = vmatpush.bf16.msra.mxu2 %v2863_v19  ;;  %4204 = vst [vmem:[#allocation22_spill] sm:$0xff] %v3632_v34  ;;  %v2719_v56 = vor.u32 %v3312_v50, %v2716_v53  ;;  %v2828_v57 = vld [vmem:[#allocation5 + $0x350] sm:$0xf0]  ;;  %v3372_v2 = vld [vmem:[#allocation5 + $0x444] sm:$0xf] }
  0x59   :  { %1665 = vmatpush.bf16.msra.mxu0 %v2639_v40  ;;  %1752 = vmatpush.bf16.msra.mxu3 %v3023_v44  ;;  %v3344_v40 = vld [vmem:[#allocation5 + $0x364] sm:$0xf]  ;;  %v2588_v44 = vld [vmem:[#allocation5 + $0x170] sm:$0xf0]  ;;  %v2831_v0 = vor.u32 %v3340_v54, %v2828_v57  ;;  %v3227_v57 = vld [vmem:[#allocation2 + $0x98] sm:$0xf0] }
  0x5a   :  { %1694 = vmatpush.bf16.msra.mxu1 %v2767_v46  ;;  %v2847_v43 = vor.u32 %v3344_v40, %v2844_v41  ;;  %v2972_v46 = vld [vmem:[#allocation5 + $0x470] sm:$0xf0]  ;;  %v2591_v48 = vor.u32 %v3280_v42, %v2588_v44  ;;  %v3308_v4 = vld [vmem:[#allocation5 + $0x244] sm:$0xf] }
  0x5b   :  { %v2975_v49 = vor.u32 %v3376_v45, %v2972_v46  ;;  %v2572_v63 = vld [vmem:[#allocation5 + $0x150] sm:$0xf0]  ;;  %v3220_v9 = vld [vmem:[#allocation2 + $0x60] sm:$0xf0] }
  0x5c   :  { %1726 = vmatpush.bf16.msra.mxu2 %v2847_v43  ;;  %v2575_v1 = vor.u32 %v3276_v58, %v2572_v63  ;;  %v2956_v3 = vld [vmem:[#allocation5 + $0x450] sm:$0xf0]  ;;  %v3643_v14 = vor.u32 %v3220_v9, %v2342_v8  ;;  %v3336_v21 = vld [vmem:[#allocation5 + $0x324] sm:$0xf]  ;;  %v2372_v63 = vld [vmem:[#allocation2 + $0x9c] sm:$0xf0] }
  0x5d   :  { %1666 = vmatpush.bf16.msra.mxu0 %v2623_v6  ;;  %1753 = vmatpush.bf16.msra.mxu3 %v3007_v7  ;;  %v2959_v5 = vor.u32 %v3372_v2, %v2956_v3  ;;  %v2700_v6 = vld [vmem:[#allocation5 + $0x250] sm:$0xf0]  ;;  %v3272_v23 = vld [vmem:[#allocation5 + $0x124] sm:$0xf] }
  0x5e   :  { %1695 = vmatpush.bf16.msra.mxu1 %v2751_v11  ;;  %v2703_v7 = vor.u32 %v3308_v4, %v2700_v6  ;;  %v2344_v11 = vld [vmem:[#allocation2 + $0x64] sm:$0xf0]  ;;  %4206 = vst [vmem:[#allocation24_spill] sm:$0xff] %v3643_v14  ;;  %v2812_v22 = vld [vmem:[#allocation5 + $0x330] sm:$0xf0] }
  0x5f   :  { %v3645_v19 = vor.u32 %v3217_v10, %v2344_v11  ;;  %v2556_v25 = vld [vmem:[#allocation5 + $0x130] sm:$0xf0]  ;;  %v3304_v30 = vld [vmem:[#allocation5 + $0x224] sm:$0xf]  ;;  %v3267_v6 = vld [vmem:[#allocation5 + $0xf4] sm:$0xf0] }
  0x60   :  { %1727 = vmatpush.bf16.msra.mxu2 %v2831_v0  ;;  %v2940_v27 = vld [vmem:[#allocation5 + $0x430] sm:$0xf0]  ;;  %v2559_v28 = vor.u32 %v3272_v23, %v2556_v25  ;;  %v3332_v33 = vld [vmem:[#allocation5 + $0x304] sm:$0xf]  ;;  %v2378_v0 = vld [vmem:[#allocation2 + $0x88] sm:$0xf] }
  0x61   :  { %1667 = vmatpush.bf16.msra.mxu0 %v2607_v20  ;;  %1754 = vmatpush.bf16.msra.mxu3 %v2991_v24  ;;  %4207 = vst [vmem:[#allocation25_spill] sm:$0xff] %v3645_v19  ;;  %v3647_v20 = vor.u32 %v3221_v13, %v2350_v12  ;;  %v2815_v24 = vor.u32 %v3336_v21, %v2812_v22  ;;  %v2684_v32 = vld [vmem:[#allocation5 + $0x230] sm:$0xf0]  ;;  %v3268_v42 = vld [vmem:[#allocation5 + $0x104] sm:$0xf] }
  0x62   :  { %1455 = vmatmul.bf16.gmra.mxu0 %v3620_v59  ;;  %1696 = vmatpush.bf16.msra.mxu1 %v2735_v26  ;;  %v3368_v26 = vld [vmem:[#allocation5 + $0x424] sm:$0xf]  ;;  %v2687_v40 = vor.u32 %v3304_v30, %v2684_v32  ;;  %v2796_v41 = vld [vmem:[#allocation5 + $0x310] sm:$0xf0]  ;;  %v2658_v10 = vld [vmem:[#allocation5 + $0x1e8] sm:$0xf] }
  0x63   :  { %1513 = vmatmul.bf16.gmra.mxu2 %v3624_v61  ;;  %v2943_v29 = vor.u32 %v3368_v26, %v2940_v27  ;;  %v2540_v43 = vld [vmem:[#allocation5 + $0x110] sm:$0xf0]  ;;  %v2799_v44 = vor.u32 %v3332_v33, %v2796_v41  ;;  %v3364_v46 = vld [vmem:[#allocation5 + $0x404] sm:$0xf]  ;;  %v3299_v11 = vld [vmem:[#allocation5 + $0x1f4] sm:$0xf0] }
  0x64   :  { %1484 = vmatmul.bf16.gmra.mxu1 %v3622_v60  ;;  %1728 = vmatpush.bf16.msra.mxu2 %v2815_v24  ;;  %v2543_v45 = vor.u32 %v3268_v42, %v2540_v43  ;;  %v2668_v53 = vld [vmem:[#allocation5 + $0x210] sm:$0xf0]  ;;  %v3224_v58 = vld [vmem:[#allocation2 + $0x84] sm:$0xf]  ;;  %v2659_v13 = vor.u32 %v3299_v11, %v2658_v10  ;;  %v2398_v21 = vld [vmem:[#allocation2 + $0xb8] sm:$0xf] }
  0x65   :  { %1668 = vmatpush.bf16.msra.mxu0 %v2591_v48  ;;  %1755 = vmatpush.bf16.msra.mxu3 %v2975_v49  ;;  %v2924_v48 = vld [vmem:[#allocation5 + $0x410] sm:$0xf0]  ;;  %v3300_v49 = vld [vmem:[#allocation5 + $0x204] sm:$0xf]  ;;  %v3656_v3 = vor.u32 %v3224_v58, %v2372_v63  ;;  %v3231_v25 = vld [vmem:[#allocation2 + $0xbc] sm:$0xf] }
  0x66   :  { %1542 = vmatmul.bf16.gmra.mxu3 %v3626_v62  ;;  %1697 = vmatpush.bf16.msra.mxu1 %v2719_v56  ;;  %v2927_v50 = vor.u32 %v3364_v46, %v2924_v48  ;;  %v2671_v54 = vor.u32 %v3300_v49, %v2668_v53  ;;  %v2370_v56 = vld [vmem:[#allocation2 + $0x80] sm:$0xf]  ;;  %v3164_v9 = vld [vmem:[#allocation5 + $0x5f0] sm:$0xf0]  ;;  %v3428_v23 = vld [vmem:[#allocation5 + $0x604] sm:$0xf] }
  0x67   :  { %v3654_v2 = vor.u32 %v3227_v57, %v2370_v56  ;;  %4209 = vst [vmem:[#allocation27_spill] sm:$0xff] %v3656_v3  ;;  %v3234_v22 = vld [vmem:[#allocation2 + $0xd0] sm:$0xf0]  ;;  %v2514_v27 = vld [vmem:[#allocation5 + $0xc8] sm:$0xf] }
  0x68   :  { %1729 = vmatpush.bf16.msra.mxu2 %v2799_v44  ;;  %v3180_v24 = vld [vmem:[#allocation5 + $0x610] sm:$0xf0]  ;;  %v2642_v33 = vld [vmem:[#allocation5 + $0x1c8] sm:$0xf]  ;;  %v2400_v41 = vld [vmem:[#allocation2 + $0xd4] sm:$0xf0]  ;;  %v3665_v46 = vor.u32 %v3234_v22, %v2398_v21 }
  0x69   :  { %1669 = vmatpush.bf16.msra.mxu0 %v2575_v1  ;;  %1756 = vmatpush.bf16.msra.mxu3 %v2959_v5  ;;  %v3228_v1 = vld [vmem:[#allocation2 + $0xa0] sm:$0xf0]  ;;  %4208 = vst [vmem:[#allocation26_spill] sm:$0xff] %v3654_v2  ;;  %v2530_v5 = vld [vmem:[#allocation5 + $0xe8] sm:$0xf]  ;;  %v3183_v26 = vor.u32 %v3428_v23, %v3180_v24  ;;  %v3667_v48 = vor.u32 %v3231_v25, %v2400_v41 }
  0x6a   :  { %1698 = vmatpush.bf16.msra.mxu1 %v2703_v7  ;;  %v3658_v4 = vor.u32 %v3228_v1, %v2378_v0  ;;  %v3424_v7 = vld [vmem:[#allocation5 + $0x5e4] sm:$0xf]  ;;  %v2531_v8 = vor.u32 %v3267_v6, %v2530_v5  ;;  %v3148_v32 = vld [vmem:[#allocation5 + $0x5d0] sm:$0xf0]  ;;  %v2406_v42 = vld [vmem:[#allocation2 + $0xc0] sm:$0xf] }
  0x6b   :  { %v3167_v12 = vor.u32 %v3424_v7, %v3164_v9  ;;  %v3235_v43 = vld [vmem:[#allocation2 + $0xd8] sm:$0xf0]  ;;  %4210 = vst [vmem:[#allocation28_spill] sm:$0xff] %v3665_v46  ;;  %v3259_v53 = vld [vmem:[#allocation5 + $0xb4] sm:$0xf0] }
  0x6c   :  { %4211 = vst [vmem:[#allocation29_spill] sm:$0xff] %v3667_v48  ;;  %v3669_v49 = vor.u32 %v3235_v43, %v2406_v42  ;;  %v3132_v57 = vld [vmem:[#allocation5 + $0x5b0] sm:$0xf0]  ;;  %v2626_v58 = vld [vmem:[#allocation5 + $0x1a8] sm:$0xf] }
  0x6d   :  { %1670 = vmatpush.bf16.msra.mxu0 %v2559_v28  ;;  %1757 = vmatpush.bf16.msra.mxu3 %v2943_v29  ;;  %v3263_v28 = vld [vmem:[#allocation5 + $0xd4] sm:$0xf0]  ;;  %v3420_v29 = vld [vmem:[#allocation5 + $0x5c4] sm:$0xf]  ;;  %v2482_v5 = vld [vmem:[#allocation5 + $0x88] sm:$0xf] }
  0x6e   :  { %1699 = vmatpush.bf16.msra.mxu1 %v2687_v40  ;;  %v2515_v30 = vor.u32 %v3263_v28, %v2514_v27  ;;  %v3295_v40 = vld [vmem:[#allocation5 + $0x1d4] sm:$0xf0]  ;;  %v3151_v44 = vor.u32 %v3420_v29, %v3148_v32  ;;  %4212 = vst [vmem:[#allocation30_spill] sm:$0xff] %v3669_v49  ;;  %v3412_v7 = vld [vmem:[#allocation5 + $0x584] sm:$0xf] }
  0x6f   :  { %v3291_v63 = vld [vmem:[#allocation5 + $0x1b4] sm:$0xf0]  ;;  %v3116_v9 = vld [vmem:[#allocation5 + $0x590] sm:$0xf0]  ;;  %v2610_v10 = vld [vmem:[#allocation5 + $0x188] sm:$0xf] }
  0x70   :  { %v2627_v1 = vor.u32 %v3291_v63, %v2626_v58  ;;  %v3255_v6 = vld [vmem:[#allocation5 + $0x94] sm:$0xf0]  ;;  %v2466_v23 = vld [vmem:[#allocation5 + $0x68] sm:$0xf]  ;;  %v3408_v25 = vld [vmem:[#allocation5 + $0x564] sm:$0xf] }
  0x71   :  { %1671 = vmatpush.bf16.msra.mxu0 %v2543_v45  ;;  %1758 = vmatpush.bf16.msra.mxu3 %v2927_v50  ;;  %v2643_v45 = vor.u32 %v3295_v40, %v2642_v33  ;;  %v2498_v50 = vld [vmem:[#allocation5 + $0xa8] sm:$0xf]  ;;  %v3287_v11 = vld [vmem:[#allocation5 + $0x194] sm:$0xf0]  ;;  %v3100_v27 = vld [vmem:[#allocation5 + $0x570] sm:$0xf0] }
  0x72   :  { %1556 = vmatmul.bf16.vlgmr.msrb.gmra.mxu0 %v3632_v34  ;;  %1700 = vmatpush.bf16.msra.mxu1 %v2671_v54  ;;  %v3416_v54 = vld [vmem:[#allocation5 + $0x5a4] sm:$0xf]  ;;  %v2499_v56 = vor.u32 %v3259_v53, %v2498_v50  ;;  %v3251_v24 = vld [vmem:[#allocation5 + $0x74] sm:$0xf0]  ;;  %v2594_v28 = vld [vmem:[#allocation5 + $0x168] sm:$0xf]  ;;  %v3103_v32 = vor.u32 %v3408_v25, %v3100_v27 }
  0x73   :  { %3192 = vmatmul.msk.bf16.vlgmr.msrb.gmra.mxu2 %vm1419_vm0, %v3636_v38  ;;  %v3135_v0 = vor.u32 %v3416_v54, %v3132_v57  ;;  %v3283_v29 = vld [vmem:[#allocation5 + $0x174] sm:$0xf0]  ;;  %v2450_v43 = vld [vmem:[#allocation5 + $0x48] sm:$0xf]  ;;  %v3084_v53 = vld [vmem:[#allocation5 + $0x550] sm:$0xf0] }
  0x74   :  { %1585 = vmatmul.bf16.vlgmr.msrb.gmra.mxu1 %v3634_v37  ;;  %1838 = vmatpush.bf16.msrb.mxu2 %v2531_v8  ;;  %v2483_v8 = vor.u32 %v3255_v6, %v2482_v5  ;;  %v2595_v33 = vor.u32 %v3283_v29, %v2594_v28  ;;  %v2578_v54 = vld [vmem:[#allocation5 + $0x148] sm:$0xf]  ;;  %v3239_v29 = vld [vmem:[#allocation5 + $0x14] sm:$0xf0] }
  0x75   :  { %1780 = vmatpush.bf16.msrb.mxu0 %v3167_v12  ;;  %v3119_v12 = vor.u32 %v3412_v7, %v3116_v9  ;;  %v2434_v6 = vld [vmem:[#allocation5 + $0x28] sm:$0xf]  ;;  %v3243_v7 = vld [vmem:[#allocation5 + $0x34] sm:$0xf0] }
  0x76   :  { %1643 = vmatmul.bf16.vlgmr.msrb.gmra.mxu3 %v3584_v47  ;;  %1816 = vmatpush.bf16.msrb.mxu1 %v3183_v26  ;;  %v2467_v26 = vor.u32 %v3251_v24, %v2466_v23  ;;  %v2435_v9 = vor.u32 %v3243_v7, %v2434_v6  ;;  %v2418_v28 = vld [vmem:[#allocation5 + $0x8] sm:$0xf]  ;;  %v3395_v7 = vld [vmem:[#allocation5 + $0x4f4] sm:$0xf0] }
  0x77   :  { %1867 = vmatpush.bf16.msrb.mxu3 %v2659_v13  ;;  %v2611_v13 = vor.u32 %v3287_v11, %v2610_v10  ;;  %v3068_v10 = vld [vmem:[#allocation5 + $0x530] sm:$0xf0]  ;;  %v2562_v11 = vld [vmem:[#allocation5 + $0x128] sm:$0xf] }
  0x78   :  { %1839 = vmatpush.bf16.msrb.mxu2 %v2515_v30  ;;  %v3042_v6 = vld [vmem:[#allocation5 + $0x4e8] sm:$0xf] }
  0x79   :  { %1781 = vmatpush.bf16.msrb.mxu0 %v3151_v44  ;;  %v3247_v44 = vld [vmem:[#allocation5 + $0x54] sm:$0xf0] }
  0x7a   :  { %v2451_v50 = vor.u32 %v3247_v44, %v2450_v43  ;;  %v3052_v43 = vld [vmem:[#allocation5 + $0x510] sm:$0xf0]  ;;  %v2546_v44 = vld [vmem:[#allocation5 + $0x108] sm:$0xf] }
  0x7b   :  { %1868 = vmatpush.bf16.msrb.mxu3 %v2643_v45  ;;  %v3404_v45 = vld [vmem:[#allocation5 + $0x544] sm:$0xf] }
  0x7c   :  { %1840 = vmatpush.bf16.msrb.mxu2 %v2499_v56  ;;  %v3279_v56 = vld [vmem:[#allocation5 + $0x154] sm:$0xf0]  ;;  %v3087_v57 = vor.u32 %v3404_v45, %v3084_v53 }
  0x7d   :  { %1782 = vmatpush.bf16.msrb.mxu0 %v3135_v0  ;;  %v2579_v58 = vor.u32 %v3279_v56, %v2578_v54  ;;  %v3271_v45 = vld [vmem:[#allocation5 + $0x114] sm:$0xf0] }
  0x7e   :  { %v2547_v53 = vor.u32 %v3271_v45, %v2546_v44  ;;  %v3363_v44 = vld [vmem:[#allocation5 + $0x3f4] sm:$0xf0] }
  0x7f   :  { %1869 = vmatpush.bf16.msrb.mxu3 %v2627_v1 }
  0x80   :  { %1841 = vmatpush.bf16.msrb.mxu2 %v2483_v8  ;;  %v3400_v8 = vld [vmem:[#allocation5 + $0x524] sm:$0xf] }
  0x81   :  { %1783 = vmatpush.bf16.msrb.mxu0 %v3119_v12  ;;  %v3275_v12 = vld [vmem:[#allocation5 + $0x134] sm:$0xf0]  ;;  %v3071_v23 = vor.u32 %v3400_v8, %v3068_v10  ;;  %v2786_v8 = vld [vmem:[#allocation5 + $0x2e8] sm:$0xf] }
  0x82   :  { %1561 = vmatmul.bf16.gmra.mxu0 %v3643_v14  ;;  %v2563_v24 = vor.u32 %v3275_v12, %v2562_v11  ;;  %v3331_v10 = vld [vmem:[#allocation5 + $0x2f4] sm:$0xf0]  ;;  %v3170_v11 = vld [vmem:[#allocation5 + $0x5e8] sm:$0xf] }
  0x83   :  { %3193 = vmatmul.msk.bf16.gmra.mxu2 %vm1419_vm0, %v3647_v20  ;;  %1870 = vmatpush.bf16.msrb.mxu3 %v2611_v13  ;;  %v3427_v12 = vld [vmem:[#allocation5 + $0x5f4] sm:$0xf0] }
  0x84   :  { %1590 = vmatmul.bf16.gmra.mxu1 %v3645_v19  ;;  %1842 = vmatpush.bf16.msrb.mxu2 %v2467_v26 }
  0x85   :  { %1784 = vmatpush.bf16.msrb.mxu0 %v3103_v32  ;;  %v3396_v32 = vld [vmem:[#allocation5 + $0x504] sm:$0xf] }
  0x86   :  { %1648 = vmatmul.bf16.gmra.mxu3 %v3596_v31 }
  0x87   :  { %1871 = vmatpush.bf16.msrb.mxu3 %v2595_v33  ;;  %v2419_v33 = vor.u32 %v3239_v29, %v2418_v28  ;;  %v3171_v28 = vor.u32 %v3427_v12, %v3170_v11 }
  0x88   :  { %1843 = vmatpush.bf16.msrb.mxu2 %v2451_v50  ;;  %v3055_v50 = vor.u32 %v3396_v32, %v3052_v43  ;;  %v2914_v43 = vld [vmem:[#allocation5 + $0x3e8] sm:$0xf] }
  0x89   :  { %1785 = vmatpush.bf16.msrb.mxu0 %v3087_v57  ;;  %v2915_v45 = vor.u32 %v3363_v44, %v2914_v43 }
  0x8b   :  { %1872 = vmatpush.bf16.msrb.mxu3 %v2579_v58 }
  0x8c   :  { %1844 = vmatpush.bf16.msrb.mxu2 %v2435_v9  ;;  %v3043_v9 = vor.u32 %v3395_v7, %v3042_v6  ;;  %v2770_v6 = vld [vmem:[#allocation5 + $0x2c8] sm:$0xf] }
  0x8d   :  { %1786 = vmatpush.bf16.msrb.mxu0 %v3071_v23 }
  0x8f   :  { %1873 = vmatpush.bf16.msrb.mxu3 %v2563_v24  ;;  %v2787_v24 = vor.u32 %v3331_v10, %v2786_v8  ;;  %v3423_v8 = vld [vmem:[#allocation5 + $0x5d4] sm:$0xf0]  ;;  %v3732_v10 = vld [vmem:[#allocation7] sm:$0xf] }
  0x90   :  { %1845 = vmatpush.bf16.msrb.mxu2 %v2419_v33  ;;  %4213 = vst [vmem:[#allocation31_spill] sm:$0xff] %v3732_v10 }
  0x91   :  { %1787 = vmatpush.bf16.msrb.mxu0 %v3055_v50  ;;  %v3026_v50 = vld [vmem:[#allocation5 + $0x4c8] sm:$0xf] }
  0x92   :  { %1566 = vmatmul.bf16.gmra.mxu0 %v3654_v2 }
  0x93   :  { %3194 = vmatmul.msk.bf16.gmra.mxu2 %vm1419_vm0, %v3658_v4  ;;  %1874 = vmatpush.bf16.msrb.mxu3 %v2547_v53  ;;  %v3391_v53 = vld [vmem:[#allocation5 + $0x4d4] sm:$0xf0] }
  0x94   :  { %1595 = vmatmul.bf16.gmra.mxu1 %v3656_v3  ;;  %v3027_v7 = vor.u32 %v3391_v53, %v3026_v50  ;;  %v2898_v50 = vld [vmem:[#allocation5 + $0x3c8] sm:$0xf]  ;;  %v3359_v53 = vld [vmem:[#allocation5 + $0x3d4] sm:$0xf0] }
  0x96   :  { %1653 = vmatmul.bf16.gmra.mxu3 %v3608_v15 }
  0xa2   :  { %1571 = vmatmul.bf16.gmra.mxu0 %v3665_v46 }
  0xa3   :  { %3195 = vmatmul.msk.bf16.gmra.mxu2 %vm1419_vm0, %v3669_v49 }
  0xa4   :  { %1600 = vmatmul.bf16.gmra.mxu1 %v3667_v48 }
  0xa6   :  { %1658 = vmatmul.bf16.gmra.mxu3 %v3620_v59 }
  0xaf   :  { %v3676_v21 = vpop.f32.mrf.mxu0 }
  0xb1   :  { %v3678_v22 = vpop.f32.mrf.mxu1 }
  0xb2   :  { %1672 = vmatmul.bf16.vlgmr.msra.gmra.mxu0 %v3586_v51 }
  0xb3   :  { %1730 = vmatmul.bf16.vlgmr.msra.gmra.mxu2 %v3590_v55  ;;  %1896 = vmatpush.bf16.msra.mxu0 %v2787_v24  ;;  %v3737_v24 = vperm.slane %v3732_v10, 0  ;;  %v3419_v10 = vld [vmem:[#allocation5 + $0x5b4] sm:$0xf0] }
  0xb4   :  { %1701 = vmatmul.bf16.vlgmr.msra.gmra.mxu1 %v3588_v52  ;;  %1954 = vmatpush.bf16.msra.mxu2 %v3043_v9 }
  0xb5   :  { %1925 = vmatpush.bf16.msra.mxu1 %v2915_v45  ;;  %v3010_v45 = vld [vmem:[#allocation5 + $0x4a8] sm:$0xf] }
  0xb6   :  { %1759 = vmatmul.bf16.vlgmr.msra.gmra.mxu3 %v3632_v34  ;;  %v3684_v30 = vpop.f32.mrf.mxu2 }
  0xb7   :  { %v3688_v41 = vpop.f32.mrf.mxu0  ;;  %1983 = vmatpush.bf16.msra.mxu3 %v3171_v28 }
  0xb8   :  { %1955 = vmatpush.bf16.msra.mxu2 %v3027_v7  ;;  %v2754_v7 = vld [vmem:[#allocation5 + $0x2a8] sm:$0xf] }
  0xb9   :  { %v3686_v40 = vpop.f32.mrf.mxu3  ;;  %v3690_v42 = vpop.f32.mrf.mxu1 }
  0xbe   :  { %v3692_v63 = vpop.f32.mrf.mxu2 }
  0xbf   :  { %v3696_v1 = vpop.f32.mrf.mxu0 }
  0xc1   :  { %v3694_v0 = vpop.f32.mrf.mxu3  ;;  %v3698_v5 = vpop.f32.mrf.mxu1 }
  0xc2   :  { %1677 = vmatmul.bf16.gmra.mxu0 %v3598_v35 }
  0xc3   :  { %1735 = vmatmul.bf16.gmra.mxu2 %v3602_v39  ;;  %v3383_v39 = vld [vmem:[#allocation5 + $0x494] sm:$0xf0] }
  0xc4   :  { %1706 = vmatmul.bf16.gmra.mxu1 %v3600_v36  ;;  %v2738_v36 = vld [vmem:[#allocation5 + $0x288] sm:$0xf] }
  0xc6   :  { %1764 = vmatmul.bf16.gmra.mxu3 %v3643_v14  ;;  %v3704_v13 = vpop.f32.mrf.mxu2 }
  0xc7   :  { %v3708_v26 = vpop.f32.mrf.mxu0 }
  0xc9   :  { %v3706_v25 = vpop.f32.mrf.mxu3  ;;  %v3710_v27 = vpop.f32.mrf.mxu1 }
  0xce   :  { %v3712_v54 = vpop.f32.mrf.mxu2 }
  0xcf   :  { %v3716_v57 = vpop.f32.mrf.mxu0 }
  0xd1   :  { %v3714_v56 = vpop.f32.mrf.mxu3  ;;  %v3718_v58 = vpop.f32.mrf.mxu1 }
  0xd2   :  { %1682 = vmatmul.bf16.gmra.mxu0 %v3610_v16 }
  0xd3   :  { %1740 = vmatmul.bf16.gmra.mxu2 %v3614_v18  ;;  %v3154_v18 = vld [vmem:[#allocation5 + $0x5c8] sm:$0xf] }
  0xd4   :  { %1711 = vmatmul.bf16.gmra.mxu1 %v3612_v17  ;;  %v3155_v12 = vor.u32 %v3423_v8, %v3154_v18  ;;  %v1442_v18 = vadd.f32 %v3676_v21, %v3737_v24 }
  0xd6   :  { %1769 = vmatmul.bf16.gmra.mxu3 %v3654_v2  ;;  %v3724_v23 = vpop.f32.mrf.mxu2  ;;  %v3327_v2 = vld [vmem:[#allocation5 + $0x2d4] sm:$0xf0]  ;;  %v1471_v21 = vadd.f32 %v3678_v22, %v1442_v18  ;;  %v3122_v22 = vld [vmem:[#allocation5 + $0x588] sm:$0xf] }
  0xd7   :  { %v3728_v32 = vpop.f32.mrf.mxu0  ;;  %v2771_v11 = vor.u32 %v3327_v2, %v2770_v6  ;;  %1984 = vmatpush.bf16.msra.mxu3 %v3155_v12  ;;  %v2899_v2 = vor.u32 %v3359_v53, %v2898_v50  ;;  %v3387_v6 = vld [vmem:[#allocation5 + $0x4b4] sm:$0xf0]  ;;  %v3138_v12 = vld [vmem:[#allocation5 + $0x5a8] sm:$0xf] }
  0xd8   :  { %v3011_v8 = vor.u32 %v3387_v6, %v3010_v45  ;;  %v3139_v53 = vor.u32 %v3419_v10, %v3138_v12  ;;  %v3355_v45 = vld [vmem:[#allocation5 + $0x3b4] sm:$0xf0] }
  0xd9   :  { %v3726_v29 = vpop.f32.mrf.mxu3  ;;  %v3730_v33 = vpop.f32.mrf.mxu1  ;;  %1897 = vmatpush.bf16.msra.mxu0 %v2771_v11  ;;  %1926 = vmatpush.bf16.msra.mxu1 %v2899_v2  ;;  %v3323_v11 = vld [vmem:[#allocation5 + $0x2b4] sm:$0xf0]  ;;  %v2882_v2 = vld [vmem:[#allocation5 + $0x3a8] sm:$0xf] }
  0xda   :  { %v2755_v50 = vor.u32 %v3323_v11, %v2754_v7  ;;  %1956 = vmatpush.bf16.msra.mxu2 %v3011_v8  ;;  %v2883_v6 = vor.u32 %v3355_v45, %v2882_v2  ;;  %v1500_v7 = vadd.f32 %v3684_v30, %v1471_v21  ;;  %v3319_v11 = vld [vmem:[#allocation5 + $0x294] sm:$0xf0]  ;;  %v1444_v8 = vadd.f32 %v3688_v41, %v3737_v24  ;;  %v2866_v45 = vld [vmem:[#allocation5 + $0x388] sm:$0xf] }
  0xdb   :  { %1985 = vmatpush.bf16.msra.mxu3 %v3139_v53  ;;  %v3415_v18 = vld [vmem:[#allocation5 + $0x594] sm:$0xf0]  ;;  %v2739_v12 = vor.u32 %v3319_v11, %v2738_v36 }
  0xdc   :  { %v3123_v34 = vor.u32 %v3415_v18, %v3122_v22  ;;  %v1529_v53 = vadd.f32 %v3686_v40, %v1500_v7  ;;  %v3351_v36 = vld [vmem:[#allocation5 + $0x394] sm:$0xf0]  ;;  %v3106_v18 = vld [vmem:[#allocation5 + $0x568] sm:$0xf] }
  0xdd   :  { %1898 = vmatpush.bf16.msra.mxu0 %v2755_v50  ;;  %1927 = vmatpush.bf16.msra.mxu1 %v2883_v6  ;;  %v2867_v6 = vor.u32 %v3351_v36, %v2866_v45  ;;  %v3379_v40 = vld [vmem:[#allocation5 + $0x474] sm:$0xf0] }
  0xde   :  { %v3734_v9 = vpop.f32.mrf.mxu2  ;;  %v3315_v22 = vld [vmem:[#allocation5 + $0x274] sm:$0xf0] }
  0xdf   :  { %v3741_v43 = vpop.f32.mrf.mxu0  ;;  %1986 = vmatpush.bf16.msra.mxu3 %v3123_v34  ;;  %v2978_v34 = vld [vmem:[#allocation5 + $0x468] sm:$0xf] }
  0xe0   :  { %v2979_v11 = vor.u32 %v3379_v40, %v2978_v34  ;;  %v3347_v34 = vld [vmem:[#allocation5 + $0x374] sm:$0xf0] }
  0xe1   :  { %v3739_v28 = vpop.f32.mrf.mxu3  ;;  %v3743_v44 = vpop.f32.mrf.mxu1  ;;  %1899 = vmatpush.bf16.msra.mxu0 %v2739_v12  ;;  %1928 = vmatpush.bf16.msra.mxu1 %v2867_v6  ;;  %v3411_v12 = vld [vmem:[#allocation5 + $0x574] sm:$0xf0] }
  0xe2   :  { %1687 = vmatmul.bf16.gmra.mxu0 %v3622_v60 }
  0xe3   :  { %1745 = vmatmul.bf16.gmra.mxu2 %v3626_v62  ;;  %v2994_v62 = vld [vmem:[#allocation5 + $0x488] sm:$0xf] }
  0xe4   :  { %1716 = vmatmul.bf16.gmra.mxu1 %v3624_v61  ;;  %v2995_v10 = vor.u32 %v3383_v39, %v2994_v62  ;;  %v1473_v62 = vadd.f32 %v3690_v42, %v1444_v8  ;;  %v2722_v42 = vld [vmem:[#allocation5 + $0x268] sm:$0xf] }
  0xe5   :  { %v2723_v8 = vor.u32 %v3315_v22, %v2722_v42  ;;  %v3375_v42 = vld [vmem:[#allocation5 + $0x454] sm:$0xf0]  ;;  %v2706_v22 = vld [vmem:[#allocation5 + $0x248] sm:$0xf] }
  0xe6   :  { %1774 = vmatmul.bf16.gmra.mxu3 %v3665_v46  ;;  %v3751_v17 = vpop.f32.mrf.mxu2  ;;  %1957 = vmatpush.bf16.msra.mxu2 %v2995_v10  ;;  %v1502_v41 = vadd.f32 %v3692_v63, %v1473_v62  ;;  %v1447_v10 = vadd.f32 %v3696_v1, %v3737_v24 }
  0xe7   :  { %v3756_v61 = vpop.f32.mrf.mxu0  ;;  %1900 = vmatpush.bf16.msra.mxu0 %v2723_v8 }
  0xe8   :  { %v1531_v1 = vadd.f32 %v3694_v0, %v1502_v41 }
  0xe9   :  { %v3754_v14 = vpop.f32.mrf.mxu3  ;;  %v3758_v46 = vpop.f32.mrf.mxu1 }
  0xea   :  { %1958 = vmatpush.bf16.msra.mxu2 %v2979_v11 }
  0xee   :  { %v3763_v50 = vpop.f32.mrf.mxu2 }
  0xef   :  { %v1557_v30 = vpop.f32.mrf.mxu0 }
  0xf0   :  { %v1558_v21 = vadd.f32 %v1557_v30, %v1529_v53  ;;  %v3107_v53 = vor.u32 %v3411_v12, %v3106_v18  ;;  %v1476_v30 = vadd.f32 %v3698_v5, %v1447_v10  ;;  %v3311_v5 = vld [vmem:[#allocation5 + $0x254] sm:$0xf0]  ;;  %v3090_v10 = vld [vmem:[#allocation5 + $0x548] sm:$0xf]  ;;  %v1449_v12 = vadd.f32 %v3708_v26, %v3737_v24 }
  0xf1   :  { %v3766_v2 = vpop.f32.mrf.mxu3  ;;  %v1586_v39 = vpop.f32.mrf.mxu1  ;;  %v2707_v18 = vor.u32 %v3311_v5, %v2706_v22  ;;  %v3403_v5 = vld [vmem:[#allocation5 + $0x534] sm:$0xf0] }
  0xf2   :  { %1788 = vmatmul.bf16.vlgmr.msrb.gmra.mxu0 %v3634_v37  ;;  %v1587_v7 = vadd.f32 %v1586_v39, %v1558_v21  ;;  %1987 = vmatpush.bf16.msra.mxu3 %v3107_v53  ;;  %v2850_v21 = vld [vmem:[#allocation5 + $0x368] sm:$0xf]  ;;  %v1505_v0 = vadd.f32 %v3704_v13, %v1476_v30  ;;  %v1478_v30 = vadd.f32 %v3710_v27, %v1449_v12  ;;  %v3371_v27 = vld [vmem:[#allocation5 + $0x434] sm:$0xf0] }
  0xf3   :  { %1846 = vmatmul.bf16.vlgmr.msrb.gmra.mxu2 %v3584_v47  ;;  %v2851_v40 = vor.u32 %v3347_v34, %v2850_v21  ;;  %1901 = vmatpush.bf16.msra.mxu0 %v2707_v18  ;;  %v2834_v21 = vld [vmem:[#allocation5 + $0x348] sm:$0xf]  ;;  %v3343_v34 = vld [vmem:[#allocation5 + $0x354] sm:$0xf0] }
  0xf4   :  { %3196 = vmatmul.msk.bf16.vlgmr.msrb.gmra.mxu1 %vm1419_vm0, %v3636_v38  ;;  %v1534_v53 = vadd.f32 %v3706_v25, %v1505_v0  ;;  %v2835_v26 = vor.u32 %v3343_v34, %v2834_v21  ;;  %v2946_v25 = vld [vmem:[#allocation5 + $0x428] sm:$0xf]  ;;  %v3307_v0 = vld [vmem:[#allocation5 + $0x234] sm:$0xf0] }
  0xf5   :  { %1929 = vmatpush.bf16.msra.mxu1 %v2851_v40  ;;  %v2690_v40 = vld [vmem:[#allocation5 + $0x228] sm:$0xf]  ;;  %v2947_v22 = vor.u32 %v3371_v27, %v2946_v25  ;;  %v1454_v27 = vadd.f32 %v3728_v32, %v3737_v24 }
  0xf6   :  { %1875 = vmatmul.bf16.vlgmr.msrb.gmra.mxu3 %v3586_v51  ;;  %v1615_v63 = vpop.f32.mrf.mxu2  ;;  %v2962_v51 = vld [vmem:[#allocation5 + $0x448] sm:$0xf] }
  0xf7   :  { %v1616_v62 = vadd.f32 %v1615_v63, %v1587_v7  ;;  %v1559_v36 = vpop.f32.mrf.mxu0  ;;  %v2963_v41 = vor.u32 %v3375_v42, %v2962_v51  ;;  %v3407_v7 = vld [vmem:[#allocation5 + $0x554] sm:$0xf0]  ;;  %v2674_v21 = vld [vmem:[#allocation5 + $0x208] sm:$0xf] }
  0xf8   :  { %v1560_v39 = vadd.f32 %v1559_v36, %v1531_v1  ;;  %v3091_v11 = vor.u32 %v3407_v7, %v3090_v10  ;;  %v2691_v10 = vor.u32 %v3307_v0, %v2690_v40  ;;  %v3335_v0 = vld [vmem:[#allocation5 + $0x314] sm:$0xf0] }
  0xf9   :  { %v3779_v45 = vpop.f32.mrf.mxu3  ;;  %v1588_v6 = vpop.f32.mrf.mxu1  ;;  %2244 = vst [vmem:[#allocation8] sm:$0xff] %v1616_v62  ;;  %1959 = vmatpush.bf16.msra.mxu2 %v2963_v41  ;;  %1930 = vmatpush.bf16.msra.mxu1 %v2835_v26  ;;  %v3074_v41 = vld [vmem:[#allocation5 + $0x528] sm:$0xf] }
  0xfa   :  { %v1589_v63 = vadd.f32 %v1588_v6, %v1560_v39  ;;  %1988 = vmatpush.bf16.msra.mxu3 %v3091_v11  ;;  %v1507_v6 = vadd.f32 %v3712_v54, %v1478_v30  ;;  %v1452_v39 = vadd.f32 %v3716_v57, %v3737_v24  ;;  %v3075_v7 = vor.u32 %v3403_v5, %v3074_v41  ;;  %v2930_v30 = vld [vmem:[#allocation5 + $0x408] sm:$0xf] }
  0xfb   :  { %1902 = vmatpush.bf16.msra.mxu0 %v2691_v10  ;;  %v3058_v26 = vld [vmem:[#allocation5 + $0x508] sm:$0xf] }
  0xfc   :  { %v1536_v57 = vadd.f32 %v3714_v56, %v1507_v6  ;;  %v1481_v18 = vadd.f32 %v3718_v58, %v1452_v39  ;;  %v3303_v58 = vld [vmem:[#allocation5 + $0x214] sm:$0xf0] }
  0xfd   :  { %1960 = vmatpush.bf16.msra.mxu2 %v2947_v22  ;;  %v3399_v6 = vld [vmem:[#allocation5 + $0x514] sm:$0xf0]  ;;  %v2675_v39 = vor.u32 %v3303_v58, %v2674_v21  ;;  %v2802_v22 = vld [vmem:[#allocation5 + $0x308] sm:$0xf] }
  0xfe   :  { %v1617_v8 = vpop.f32.mrf.mxu2  ;;  %1989 = vmatpush.bf16.msra.mxu3 %v3075_v7  ;;  %v1510_v56 = vadd.f32 %v3724_v23, %v1481_v18  ;;  %v3059_v25 = vor.u32 %v3399_v6, %v3058_v26  ;;  %v2803_v10 = vor.u32 %v3335_v0, %v2802_v22  ;;  %v3325_v22 = vld [vmem:[#allocation5 + $0x2cc] sm:$0xf] }
  0xff   :  { %v1618_v1 = vadd.f32 %v1617_v8, %v1589_v63  ;;  %v1562_v51 = vpop.f32.mrf.mxu0  ;;  %1903 = vmatpush.bf16.msra.mxu0 %v2675_v39  ;;  %v3265_v39 = vld [vmem:[#allocation5 + $0xec] sm:$0xf] }
 0x100   :  { %v1563_v36 = vadd.f32 %v1562_v51, %v1534_v53  ;;  %v3339_v51 = vld [vmem:[#allocation5 + $0x334] sm:$0xf0]  ;;  %v1539_v41 = vadd.f32 %v3726_v29, %v1510_v56  ;;  %v3297_v29 = vld [vmem:[#allocation5 + $0x1ec] sm:$0xf] }
 0x101   :  { %v3785_v62 = vpop.f32.mrf.mxu3  ;;  %v1591_v13 = vpop.f32.mrf.mxu1  ;;  %2248 = vst [vmem:[#allocation8 + $0x20] sm:$0xff] %v1618_v1  ;;  %v2818_v1 = vld [vmem:[#allocation5 + $0x328] sm:$0xf] }
 0x102   :  { %1793 = vmatmul.bf16.gmra.mxu0 %v3645_v19  ;;  %v1592_v42 = vadd.f32 %v1591_v13, %v1563_v36  ;;  %v2819_v13 = vor.u32 %v3339_v51, %v2818_v1  ;;  %v3367_v36 = vld [vmem:[#allocation5 + $0x414] sm:$0xf0]  ;;  %1990 = vmatpush.bf16.msra.mxu3 %v3059_v25  ;;  %v3329_v51 = vld [vmem:[#allocation5 + $0x2ec] sm:$0xf]  ;;  %v2532_v25 = vld [vmem:[#allocation5 + $0xf8] sm:$0xf0] }
 0x103   :  { %1851 = vmatmul.bf16.gmra.mxu2 %v3596_v31  ;;  %v2931_v34 = vor.u32 %v3367_v36, %v2930_v30  ;;  %v3431_v1 = vld [vmem:[#allocation5 + $0x614] sm:$0xf0] }
 0x104   :  { %3197 = vmatmul.msk.bf16.gmra.mxu1 %vm1419_vm0, %v3647_v20 }
 0x105   :  { %1931 = vmatpush.bf16.msra.mxu1 %v2819_v13  ;;  %1961 = vmatpush.bf16.msra.mxu2 %v2931_v34  ;;  %v2788_v13 = vld [vmem:[#allocation5 + $0x2f8] sm:$0xf0] }
 0x106   :  { %1880 = vmatmul.bf16.gmra.mxu3 %v3598_v35  ;;  %v1620_v54 = vpop.f32.mrf.mxu2  ;;  %v2791_v36 = vor.u32 %v3329_v51, %v2788_v13  ;;  %v2756_v51 = vld [vmem:[#allocation5 + $0x2b8] sm:$0xf0] }
 0x107   :  { %v1621_v11 = vadd.f32 %v1620_v54, %v1592_v42  ;;  %v1564_v63 = vpop.f32.mrf.mxu0 }
 0x108   :  { %v1565_v53 = vadd.f32 %v1564_v63, %v1536_v57  ;;  %v1483_v57 = vadd.f32 %v3730_v33, %v1454_v27  ;;  %v2660_v63 = vld [vmem:[#allocation5 + $0x1f8] sm:$0xf0]  ;;  %v3186_v33 = vld [vmem:[#allocation5 + $0x608] sm:$0xf]  ;;  %2099 = vmatpush.bf16.msrb.mxu3 %v2791_v36  ;;  %v2535_v27 = vor.u32 %v3265_v39, %v2532_v25  ;;  %v3285_v39 = vld [vmem:[#allocation5 + $0x18c] sm:$0xf] }
 0x109   :  { %v3798_v12 = vpop.f32.mrf.mxu3  ;;  %v1593_v8 = vpop.f32.mrf.mxu1  ;;  %2252 = vst [vmem:[#allocation8 + $0x40] sm:$0xff] %v1621_v11  ;;  %1932 = vmatpush.bf16.msra.mxu1 %v2803_v10  ;;  %v1457_v11 = vadd.f32 %v3741_v43, %v3737_v24  ;;  %v2612_v25 = vld [vmem:[#allocation5 + $0x198] sm:$0xf0] }
 0x10a   :  { %v1594_v40 = vadd.f32 %v1593_v8, %v1565_v53  ;;  %v1512_v32 = vadd.f32 %v3734_v9, %v1483_v57  ;;  %v2663_v53 = vor.u32 %v3297_v29, %v2660_v63  ;;  %v3187_v9 = vor.u32 %v3431_v1, %v3186_v33  ;;  %v3261_v63 = vld [vmem:[#allocation5 + $0xcc] sm:$0xf]  ;;  %v2516_v33 = vld [vmem:[#allocation5 + $0xd8] sm:$0xf0] }
 0x10b   :  { %v1486_v21 = vadd.f32 %v3743_v44, %v1457_v11  ;;  %v2772_v44 = vld [vmem:[#allocation5 + $0x2d8] sm:$0xf0] }
 0x10c   :  { %v1541_v43 = vadd.f32 %v3739_v28, %v1512_v32  ;;  %2070 = vmatpush.bf16.msrb.mxu2 %v2663_v53  ;;  %2019 = vmatpush.bf16.msrb.mxu0 %v3187_v9 }
 0x10d   :  { %v1515_v28 = vadd.f32 %v3751_v17, %v1486_v21  ;;  %2041 = vmatpush.bf16.msrb.mxu1 %v2535_v27  ;;  %v3317_v27 = vld [vmem:[#allocation5 + $0x28c] sm:$0xf] }
 0x10e   :  { %v1622_v42 = vpop.f32.mrf.mxu2 }
 0x10f   :  { %v1623_v23 = vadd.f32 %v1622_v42, %v1594_v40  ;;  %v1567_v54 = vpop.f32.mrf.mxu0  ;;  %v3293_v40 = vld [vmem:[#allocation5 + $0x1cc] sm:$0xf]  ;;  %v2644_v42 = vld [vmem:[#allocation5 + $0x1d8] sm:$0xf0] }
 0x110   :  { %v1568_v18 = vadd.f32 %v1567_v54, %v1539_v41  ;;  %v2647_v0 = vor.u32 %v3293_v40, %v2644_v42  ;;  %v2775_v41 = vor.u32 %v3325_v22, %v2772_v44  ;;  %v2615_v40 = vor.u32 %v3285_v39, %v2612_v25  ;;  %v2740_v42 = vld [vmem:[#allocation5 + $0x298] sm:$0xf0]  ;;  %v4215_v25 = vld [vmem:[#allocation14_spill] sm:$0xff] }
 0x111   :  { %v3804_v5 = vpop.f32.mrf.mxu3  ;;  %v1596_v7 = vpop.f32.mrf.mxu1  ;;  %2256 = vst [vmem:[#allocation8 + $0x60] sm:$0xff] %v1623_v23  ;;  %v1459_v23 = vadd.f32 %v3756_v61, %v3737_v24  ;;  %v2519_v61 = vor.u32 %v3261_v63, %v2516_v33  ;;  %v2743_v22 = vor.u32 %v3317_v27, %v2740_v42  ;;  %v2724_v63 = vld [vmem:[#allocation5 + $0x278] sm:$0xf0]  ;;  %v4217_v42 = vld [vmem:[#allocation24_spill] sm:$0xff] }
 0x112   :  { %1798 = vmatmul.bf16.gmra.mxu0 %v3656_v3  ;;  %v1597_v8 = vadd.f32 %v1596_v7, %v1568_v18  ;;  %2071 = vmatpush.bf16.msrb.mxu2 %v2647_v0  ;;  %v1544_v7 = vadd.f32 %v3754_v14, %v1515_v28  ;;  %v3289_v14 = vld [vmem:[#allocation5 + $0x1ac] sm:$0xf]  ;;  %v2452_v39 = vld [vmem:[#allocation5 + $0x58] sm:$0xf0] }
 0x113   :  { %1856 = vmatmul.bf16.gmra.mxu2 %v3608_v15  ;;  %2100 = vmatpush.bf16.msrb.mxu3 %v2775_v41  ;;  %v1488_v17 = vadd.f32 %v3758_v46, %v1459_v23  ;;  %v3321_v46 = vld [vmem:[#allocation5 + $0x2ac] sm:$0xf] }
 0x114   :  { %3198 = vmatmul.msk.bf16.gmra.mxu1 %vm1419_vm0, %v3658_v4 }
 0x115   :  { %v1517_v24 = vadd.f32 %v3763_v50, %v1488_v17  ;;  %2042 = vmatpush.bf16.msrb.mxu1 %v2519_v61  ;;  %v3313_v17 = vld [vmem:[#allocation5 + $0x26c] sm:$0xf] }
 0x116   :  { %1885 = vmatmul.bf16.gmra.mxu3 %v3610_v16  ;;  %v1625_v30 = vpop.f32.mrf.mxu2  ;;  %v2727_v61 = vor.u32 %v3313_v17, %v2724_v63  ;;  %v2436_v63 = vld [vmem:[#allocation5 + $0x38] sm:$0xf0] }
 0x117   :  { %v1626_v56 = vadd.f32 %v1625_v30, %v1597_v8  ;;  %v1569_v58 = vpop.f32.mrf.mxu0  ;;  %v2628_v8 = vld [vmem:[#allocation5 + $0x1b8] sm:$0xf0]  ;;  %v2759_v30 = vor.u32 %v3321_v46, %v2756_v51  ;;  %v1546_v9 = vadd.f32 %v3766_v2, %v1517_v24  ;;  %v3249_v46 = vld [vmem:[#allocation5 + $0x6c] sm:$0xf] }
 0x118   :  { %v1570_v6 = vadd.f32 %v1569_v58, %v1541_v43  ;;  %v2631_v1 = vor.u32 %v3289_v14, %v2628_v8  ;;  %v3257_v58 = vld [vmem:[#allocation5 + $0xac] sm:$0xf] }
 0x119   :  { %v3817_v34 = vpop.f32.mrf.mxu3  ;;  %v1598_v26 = vpop.f32.mrf.mxu1  ;;  %2260 = vst [vmem:[#allocation8 + $0x80] sm:$0xff] %v1626_v56  ;;  %2101 = vmatpush.bf16.msrb.mxu3 %v2759_v30  ;;  %v3277_v51 = vld [vmem:[#allocation5 + $0x14c] sm:$0xf] }
 0x11a   :  { %v1599_v54 = vadd.f32 %v1598_v26, %v1570_v6  ;;  %2072 = vmatpush.bf16.msrb.mxu2 %v2631_v1  ;;  %v2500_v26 = vld [vmem:[#allocation5 + $0xb8] sm:$0xf0]  ;;  %v3309_v30 = vld [vmem:[#allocation5 + $0x24c] sm:$0xf] }
 0x11b   :  { %v2503_v6 = vor.u32 %v3257_v58, %v2500_v26 }
 0x11d   :  { %2043 = vmatpush.bf16.msrb.mxu1 %v2503_v6  ;;  %2102 = vmatpush.bf16.msrb.mxu3 %v2743_v22  ;;  %v3245_v6 = vld [vmem:[#allocation5 + $0x4c] sm:$0xf] }
 0x11e   :  { %v1627_v10 = vpop.f32.mrf.mxu2  ;;  %2073 = vmatpush.bf16.msrb.mxu2 %v2615_v40  ;;  %v2455_v27 = vor.u32 %v3245_v6, %v2452_v39  ;;  %v4216_v40 = vld [vmem:[#allocation15_spill] sm:$0xff]  ;;  %v3273_v22 = vld [vmem:[#allocation5 + $0x12c] sm:$0xf] }
 0x11f   :  { %v1628_v57 = vadd.f32 %v1627_v10, %v1599_v54  ;;  %v1572_v32 = vpop.f32.mrf.mxu0  ;;  %v3253_v54 = vld [vmem:[#allocation5 + $0x8c] sm:$0xf]  ;;  %v2484_v10 = vld [vmem:[#allocation5 + $0x98] sm:$0xf0] }
 0x120   :  { %v1573_v29 = vadd.f32 %v1572_v32, %v1544_v7  ;;  %v2487_v7 = vor.u32 %v3253_v54, %v2484_v10  ;;  %v3281_v32 = vld [vmem:[#allocation5 + $0x16c] sm:$0xf]  ;;  %v2692_v54 = vld [vmem:[#allocation5 + $0x238] sm:$0xf0] }
 0x121   :  { %v3823_v18 = vpop.f32.mrf.mxu3  ;;  %v1601_v11 = vpop.f32.mrf.mxu1  ;;  %2264 = vst [vmem:[#allocation8 + $0xa0] sm:$0xff] %v1628_v57  ;;  %v4214_v57 = vld [vmem:[#allocation22_spill] sm:$0xff]  ;;  %2103 = vmatpush.bf16.msrb.mxu3 %v2727_v61 }
 0x122   :  { %1803 = vmatmul.bf16.gmra.mxu0 %v3667_v48  ;;  %v1602_v53 = vadd.f32 %v1601_v11, %v1573_v29  ;;  %2044 = vmatpush.bf16.msrb.mxu1 %v2487_v7  ;;  %v2596_v11 = vld [vmem:[#allocation5 + $0x178] sm:$0xf0] }
 0x123   :  { %1861 = vmatmul.bf16.gmra.mxu2 %v3620_v59  ;;  %v2599_v29 = vor.u32 %v3281_v32, %v2596_v11 }
 0x124   :  { %3199 = vmatmul.msk.bf16.gmra.mxu1 %vm1419_vm0, %v3669_v49 }
 0x125   :  { %2074 = vmatpush.bf16.msrb.mxu2 %v2599_v29  ;;  %v3241_v29 = vld [vmem:[#allocation5 + $0x2c] sm:$0xf] }
 0x126   :  { %1890 = vmatmul.bf16.gmra.mxu3 %v3622_v60  ;;  %v1630_v13 = vpop.f32.mrf.mxu2  ;;  %v2439_v61 = vor.u32 %v3241_v29, %v2436_v63  ;;  %v3361_v29 = vld [vmem:[#allocation5 + $0x3ec] sm:$0xf] }
 0x127   :  { %v1631_v36 = vadd.f32 %v1630_v13, %v1602_v53  ;;  %v1574_v43 = vpop.f32.mrf.mxu0  ;;  %v2468_v53 = vld [vmem:[#allocation5 + $0x78] sm:$0xf0] }
 0x128   :  { %v1575_v56 = vadd.f32 %v1574_v43, %v1546_v9  ;;  %v2471_v1 = vor.u32 %v3249_v46, %v2468_v53  ;;  %v2580_v13 = vld [vmem:[#allocation5 + $0x158] sm:$0xf0]  ;;  %v3269_v46 = vld [vmem:[#allocation5 + $0x10c] sm:$0xf] }
 0x129   :  { %v3833_v50 = vpop.f32.mrf.mxu3  ;;  %v1603_v21 = vpop.f32.mrf.mxu1  ;;  %2268 = vst [vmem:[#allocation8 + $0xc0] sm:$0xff] %v1631_v36  ;;  %v2583_v9 = vor.u32 %v3277_v51, %v2580_v13  ;;  %v2708_v36 = vld [vmem:[#allocation5 + $0x258] sm:$0xf0] }
 0x12a   :  { %v1604_v2 = vadd.f32 %v1603_v21, %v1575_v56  ;;  %2045 = vmatpush.bf16.msrb.mxu1 %v2471_v1  ;;  %v2711_v43 = vor.u32 %v3309_v30, %v2708_v36  ;;  %v2548_v53 = vld [vmem:[#allocation5 + $0x118] sm:$0xf0]  ;;  %v3301_v1 = vld [vmem:[#allocation5 + $0x20c] sm:$0xf] }
 0x12b   :  { %2075 = vmatpush.bf16.msrb.mxu2 %v2583_v9  ;;  %v2551_v51 = vor.u32 %v3269_v46, %v2548_v53  ;;  %v2676_v13 = vld [vmem:[#allocation5 + $0x218] sm:$0xf0]  ;;  %v3237_v36 = vld [vmem:[#allocation5 + $0xc] sm:$0xf] }
 0x12c   :  { %2104 = vmatpush.bf16.msrb.mxu3 %v2711_v43  ;;  %v2679_v30 = vor.u32 %v3301_v1, %v2676_v13  ;;  %v2420_v43 = vld [vmem:[#allocation5 + $0x18] sm:$0xf0]  ;;  %v3429_v46 = vld [vmem:[#allocation5 + $0x60c] sm:$0xf] }
 0x12d   :  { %v3188_v53 = vld [vmem:[#allocation5 + $0x618] sm:$0xf0] }
 0x12e   :  { %v1632_v28 = vpop.f32.mrf.mxu2  ;;  %2046 = vmatpush.bf16.msrb.mxu1 %v2455_v27  ;;  %v2423_v27 = vor.u32 %v3237_v36, %v2420_v43  ;;  %v3191_v13 = vor.u32 %v3429_v46, %v3188_v53 }
 0x12f   :  { %v1633_v0 = vadd.f32 %v1632_v28, %v1604_v2  ;;  %v3837_v41 = vpop.f32.mrf.mxu0  ;;  %v2564_v2 = vld [vmem:[#allocation5 + $0x138] sm:$0xf0]  ;;  %v3305_v28 = vld [vmem:[#allocation5 + $0x22c] sm:$0xf] }
 0x130   :  { %v2695_v7 = vor.u32 %v3305_v28, %v2692_v54  ;;  %v4219_v28 = vld [vmem:[#allocation17_spill] sm:$0xff] }
 0x131   :  { %v3835_v44 = vpop.f32.mrf.mxu3  ;;  %v3839_v23 = vpop.f32.mrf.mxu1  ;;  %2272 = vst [vmem:[#allocation8 + $0xe0] sm:$0xff] %v1633_v0  ;;  %v2567_v0 = vor.u32 %v3273_v22, %v2564_v2  ;;  %v4218_v2 = vld [vmem:[#allocation16_spill] sm:$0xff]  ;;  %v3425_v54 = vld [vmem:[#allocation5 + $0x5ec] sm:$0xf] }
 0x132   :  { %1904 = vmatmul.bf16.vlgmr.msra.gmra.mxu0 %v3588_v52  ;;  %2105 = vmatpush.bf16.msrb.mxu3 %v2695_v7  ;;  %v3172_v7 = vld [vmem:[#allocation5 + $0x5f8] sm:$0xf0] }
 0x133   :  { %1962 = vmatmul.bf16.vlgmr.msra.gmra.mxu2 %v4214_v57  ;;  %2047 = vmatpush.bf16.msrb.mxu1 %v2439_v61  ;;  %v3175_v63 = vor.u32 %v3425_v54, %v3172_v7  ;;  %v2916_v61 = vld [vmem:[#allocation5 + $0x3f8] sm:$0xf0]  ;;  %v3421_v54 = vld [vmem:[#allocation5 + $0x5cc] sm:$0xf] }
 0x134   :  { %1933 = vmatmul.bf16.vlgmr.msra.gmra.mxu1 %v3590_v55  ;;  %2076 = vmatpush.bf16.msrb.mxu2 %v2567_v0  ;;  %v4220_v0 = vld [vmem:[#allocation26_spill] sm:$0xff]  ;;  %v3156_v7 = vld [vmem:[#allocation5 + $0x5d8] sm:$0xf0] }
 0x135   :  { %v2884_v55 = vld [vmem:[#allocation5 + $0x3b8] sm:$0xf0] }
 0x136   :  { %1991 = vmatmul.bf16.vlgmr.msra.gmra.mxu3 %v3634_v37  ;;  %v3845_v33 = vpop.f32.mrf.mxu2  ;;  %v4224_v37 = vld [vmem:[#allocation28_spill] sm:$0xff] }
 0x137   :  { %v3849_v14 = vpop.f32.mrf.mxu0  ;;  %2106 = vmatpush.bf16.msrb.mxu3 %v2679_v30  ;;  %2048 = vmatpush.bf16.msrb.mxu1 %v2423_v27  ;;  %v3393_v27 = vld [vmem:[#allocation5 + $0x4ec] sm:$0xf] }
 0x138   :  { %2077 = vmatpush.bf16.msrb.mxu2 %v2551_v51  ;;  %v2919_v51 = vor.u32 %v3361_v29, %v2916_v61  ;;  %v4221_v29 = vld [vmem:[#allocation31_spill] sm:$0xff] }
 0x139   :  { %v3847_v24 = vpop.f32.mrf.mxu3  ;;  %v3851_v8 = vpop.f32.mrf.mxu1  ;;  %v3894_v61 = vperm.slane %v4221_v29, 1 }
 0x13a   :  { %2128 = vmatpush.bf16.msra.mxu0 %v2919_v51 }
 0x13b   :  { %2222 = vmatpush.bf16.msra.mxu3 %v3191_v13  ;;  %v1645_v13 = vadd.f32 %v3779_v45, %v3894_v61 }
 0x13c   :  { %2186 = vmatpush.bf16.msra.mxu2 %v3175_v63 }
 0x13e   :  { %v3853_v21 = vpop.f32.mrf.mxu2 }
 0x13f   :  { %v3857_v58 = vpop.f32.mrf.mxu0 }
 0x141   :  { %v3855_v56 = vpop.f32.mrf.mxu3  ;;  %v3859_v26 = vpop.f32.mrf.mxu1 }
 0x142   :  { %1909 = vmatmul.bf16.gmra.mxu0 %v4215_v25 }
 0x143   :  { %1967 = vmatmul.bf16.gmra.mxu2 %v4217_v42  ;;  %v2900_v42 = vld [vmem:[#allocation5 + $0x3d8] sm:$0xf0] }
 0x144   :  { %1938 = vmatmul.bf16.gmra.mxu1 %v4216_v40 }
 0x146   :  { %1996 = vmatmul.bf16.gmra.mxu3 %v3645_v19  ;;  %v3865_v10 = vpop.f32.mrf.mxu2  ;;  %v3159_v19 = vor.u32 %v3421_v54, %v3156_v7  ;;  %v4223_v7 = vld [vmem:[#allocation21_spill] sm:$0xff] }
 0x147   :  { %v3869_v11 = vpop.f32.mrf.mxu0 }
 0x148   :  { %2187 = vmatpush.bf16.msra.mxu2 %v3159_v19  ;;  %v3417_v19 = vld [vmem:[#allocation5 + $0x5ac] sm:$0xf] }
 0x149   :  { %v3867_v32 = vpop.f32.mrf.mxu3  ;;  %v3871_v17 = vpop.f32.mrf.mxu1 }
 0x14e   :  { %v3873_v9 = vpop.f32.mrf.mxu2 }
 0x14f   :  { %v3877_v39 = vpop.f32.mrf.mxu0 }
 0x151   :  { %v3875_v6 = vpop.f32.mrf.mxu3  ;;  %v3879_v22 = vpop.f32.mrf.mxu1 }
 0x152   :  { %1914 = vmatmul.bf16.gmra.mxu0 %v4218_v2 }
 0x153   :  { %1972 = vmatmul.bf16.gmra.mxu2 %v4220_v0 }
 0x154   :  { %1943 = vmatmul.bf16.gmra.mxu1 %v4219_v28  ;;  %v3357_v28 = vld [vmem:[#allocation5 + $0x3cc] sm:$0xf] }
 0x155   :  { %v2903_v53 = vor.u32 %v3357_v28, %v2900_v42  ;;  %v1674_v42 = vadd.f32 %v3837_v41, %v1645_v13  ;;  %v3140_v28 = vld [vmem:[#allocation5 + $0x5b8] sm:$0xf0]  ;;  %v3385_v41 = vld [vmem:[#allocation5 + $0x4ac] sm:$0xf] }
 0x156   :  { %2001 = vmatmul.bf16.gmra.mxu3 %v3656_v3  ;;  %v3885_v1 = vpop.f32.mrf.mxu2  ;;  %v3044_v3 = vld [vmem:[#allocation5 + $0x4f8] sm:$0xf0]  ;;  %v3143_v57 = vor.u32 %v3417_v19, %v3140_v28 }
 0x157   :  { %v3889_v36 = vpop.f32.mrf.mxu0  ;;  %v3047_v0 = vor.u32 %v3393_v27, %v3044_v3  ;;  %2129 = vmatpush.bf16.msra.mxu0 %v2903_v53  ;;  %v3389_v3 = vld [vmem:[#allocation5 + $0x4cc] sm:$0xf]  ;;  %v4222_v27 = vld [vmem:[#allocation20_spill] sm:$0xff]  ;;  %v3012_v13 = vld [vmem:[#allocation5 + $0x4b8] sm:$0xf0] }
 0x158   :  { %v3353_v53 = vld [vmem:[#allocation5 + $0x3ac] sm:$0xf]  ;;  %2188 = vmatpush.bf16.msra.mxu2 %v3143_v57  ;;  %v3015_v28 = vor.u32 %v3385_v41, %v3012_v13  ;;  %v2996_v41 = vld [vmem:[#allocation5 + $0x498] sm:$0xf0] }
 0x159   :  { %v3887_v30 = vpop.f32.mrf.mxu3  ;;  %v3891_v43 = vpop.f32.mrf.mxu1  ;;  %2157 = vmatpush.bf16.msra.mxu1 %v3047_v0  ;;  %v3028_v0 = vld [vmem:[#allocation5 + $0x4d8] sm:$0xf0]  ;;  %v2887_v45 = vor.u32 %v3353_v53, %v2884_v55  ;;  %v3413_v53 = vld [vmem:[#allocation5 + $0x58c] sm:$0xf] }
 0x15a   :  { %v3031_v54 = vor.u32 %v3389_v3, %v3028_v0  ;;  %v1703_v0 = vadd.f32 %v3839_v23, %v1674_v42 }
 0x15b   :  { %2130 = vmatpush.bf16.msra.mxu0 %v2887_v45 }
 0x15c   :  { %v1732_v19 = vadd.f32 %v3845_v33, %v1703_v0 }
 0x15d   :  { %2158 = vmatpush.bf16.msra.mxu1 %v3031_v54  ;;  %v1647_v54 = vadd.f32 %v3785_v62, %v3894_v61 }
 0x15e   :  { %v3896_v46 = vpop.f32.mrf.mxu2  ;;  %v1761_v23 = vadd.f32 %v3847_v24, %v1732_v19  ;;  %v3345_v19 = vld [vmem:[#allocation5 + $0x36c] sm:$0xf] }
 0x15f   :  { %v3900_v40 = vpop.f32.mrf.mxu0  ;;  %v1676_v55 = vadd.f32 %v3849_v14, %v1647_v54  ;;  %v3381_v14 = vld [vmem:[#allocation5 + $0x48c] sm:$0xf] }
 0x161   :  { %v3898_v63 = vpop.f32.mrf.mxu3  ;;  %v3902_v51 = vpop.f32.mrf.mxu1  ;;  %2159 = vmatpush.bf16.msra.mxu1 %v3015_v28  ;;  %v1705_v62 = vadd.f32 %v3851_v8, %v1676_v55  ;;  %v2852_v28 = vld [vmem:[#allocation5 + $0x378] sm:$0xf0] }
 0x162   :  { %1919 = vmatmul.bf16.gmra.mxu0 %v4222_v27  ;;  %v2868_v27 = vld [vmem:[#allocation5 + $0x398] sm:$0xf0] }
 0x163   :  { %1977 = vmatmul.bf16.gmra.mxu2 %v4224_v37  ;;  %v1734_v13 = vadd.f32 %v3853_v21, %v1705_v62  ;;  %v3108_v21 = vld [vmem:[#allocation5 + $0x578] sm:$0xf0] }
 0x164   :  { %1948 = vmatmul.bf16.gmra.mxu1 %v4223_v7  ;;  %v3349_v7 = vld [vmem:[#allocation5 + $0x38c] sm:$0xf] }
 0x165   :  { %v2871_v45 = vor.u32 %v3349_v7, %v2868_v27  ;;  %v2999_v27 = vor.u32 %v3381_v14, %v2996_v41  ;;  %v4226_v7 = vld [vmem:[#allocation12_spill] sm:$0xff]  ;;  %v1763_v55 = vadd.f32 %v3855_v56, %v1734_v13  ;;  %v1652_v14 = vadd.f32 %v3804_v5, %v3894_v61 }
 0x166   :  { %2006 = vmatmul.bf16.gmra.mxu3 %v3667_v48  ;;  %v3911_v60 = vpop.f32.mrf.mxu2  ;;  %v3124_v48 = vld [vmem:[#allocation5 + $0x598] sm:$0xf0] }
 0x167   :  { %v3915_v3 = vpop.f32.mrf.mxu0  ;;  %v3127_v57 = vor.u32 %v3413_v53, %v3124_v48  ;;  %2131 = vmatpush.bf16.msra.mxu0 %v2871_v45  ;;  %v1650_v48 = vadd.f32 %v3798_v12, %v3894_v61  ;;  %2160 = vmatpush.bf16.msra.mxu1 %v2999_v27  ;;  %v3409_v12 = vld [vmem:[#allocation5 + $0x56c] sm:$0xf]  ;;  %v1681_v13 = vadd.f32 %v3869_v11, %v1652_v14 }
 0x168   :  { %v3111_v54 = vor.u32 %v3409_v12, %v3108_v21 }
 0x169   :  { %v3913_v59 = vpop.f32.mrf.mxu3  ;;  %v3918_v37 = vpop.f32.mrf.mxu1  ;;  %2189 = vmatpush.bf16.msra.mxu2 %v3127_v57  ;;  %v1679_v8 = vadd.f32 %v3857_v58, %v1650_v48 }
 0x16a   :  { %4225 = vst [vmem:[#allocation14_spill] sm:$0xff] %v3918_v37 }
 0x16b   :  { %v1708_v58 = vadd.f32 %v3859_v26, %v1679_v8  ;;  %v3092_v26 = vld [vmem:[#allocation5 + $0x558] sm:$0xf0] }
 0x16c   :  { %v2836_v8 = vld [vmem:[#allocation5 + $0x358] sm:$0xf0] }
 0x16d   :  { %2190 = vmatpush.bf16.msra.mxu2 %v3111_v54  ;;  %v1737_v56 = vadd.f32 %v3865_v10, %v1708_v58  ;;  %v1710_v10 = vadd.f32 %v3871_v17, %v1681_v13 }
 0x16e   :  { %v3925_v42 = vpop.f32.mrf.mxu2 }
 0x16f   :  { %v1789_v37 = vpop.f32.mrf.mxu0  ;;  %v1766_v12 = vadd.f32 %v3867_v32, %v1737_v56  ;;  %v1739_v32 = vadd.f32 %v3873_v9, %v1710_v10  ;;  %v2820_v9 = vld [vmem:[#allocation5 + $0x338] sm:$0xf0] }
 0x170   :  { %v1790_v33 = vadd.f32 %v1789_v37, %v1761_v23  ;;  %v3938_v37 = vperm.slane %v4221_v29, 2 }
 0x171   :  { %v3927_v49 = vpop.f32.mrf.mxu3  ;;  %v1818_v0 = vpop.f32.mrf.mxu1 }
 0x172   :  { %v1819_v24 = vadd.f32 %v1818_v0, %v1790_v33  ;;  %3200 = vmatmul.msk.bf16.vlgmr.msrb.gmra.mxu0 %vm1419_vm0, %v3636_v38  ;;  %v3377_v33 = vld [vmem:[#allocation5 + $0x46c] sm:$0xf]  ;;  %v2980_v0 = vld [vmem:[#allocation5 + $0x478] sm:$0xf0] }
 0x173   :  { %2078 = vmatmul.bf16.vlgmr.msrb.gmra.mxu2 %v4226_v7  ;;  %v2983_v48 = vor.u32 %v3377_v33, %v2980_v0  ;;  %v3341_v7 = vld [vmem:[#allocation5 + $0x34c] sm:$0xf]  ;;  %v1768_v0 = vadd.f32 %v3875_v6, %v1739_v32 }
 0x174   :  { %2049 = vmatmul.bf16.vlgmr.msrb.gmra.mxu1 %v3584_v47  ;;  %2245 = vst [vmem:[#allocation8 + $0x8] sm:$0xff] %v1819_v24  ;;  %v2855_v47 = vor.u32 %v3345_v19, %v2852_v28  ;;  %v3405_v24 = vld [vmem:[#allocation5 + $0x54c] sm:$0xf]  ;;  %v2839_v54 = vor.u32 %v3341_v7, %v2836_v8 }
 0x175   :  { %2161 = vmatpush.bf16.msra.mxu1 %v2983_v48  ;;  %v3095_v27 = vor.u32 %v3405_v24, %v3092_v26  ;;  %v3337_v33 = vld [vmem:[#allocation5 + $0x32c] sm:$0xf]  ;;  %v2948_v26 = vld [vmem:[#allocation5 + $0x438] sm:$0xf0] }
 0x176   :  { %2107 = vmatmul.bf16.vlgmr.msrb.gmra.mxu3 %v3588_v52  ;;  %v1847_v53 = vpop.f32.mrf.mxu2  ;;  %2132 = vmatpush.bf16.msra.mxu0 %v2855_v47  ;;  %v3373_v47 = vld [vmem:[#allocation5 + $0x44c] sm:$0xf]  ;;  %v2823_v56 = vor.u32 %v3337_v33, %v2820_v9 }
 0x177   :  { %v1848_v57 = vadd.f32 %v1847_v53, %v3938_v37  ;;  %v1791_v29 = vpop.f32.mrf.mxu0  ;;  %2191 = vmatpush.bf16.msra.mxu2 %v3095_v27  ;;  %v3369_v24 = vld [vmem:[#allocation5 + $0x42c] sm:$0xf]  ;;  %v1657_v27 = vadd.f32 %v3823_v18, %v3894_v61 }
 0x178   :  { %v1792_v45 = vadd.f32 %v1791_v29, %v1763_v55  ;;  %v2951_v8 = vor.u32 %v3369_v24, %v2948_v26 }
 0x179   :  { %v1876_v23 = vpop.f32.mrf.mxu3  ;;  %v1820_v62 = vpop.f32.mrf.mxu1 }
 0x17a   :  { %v3945_v52 = vadd.f32 %v1876_v23, %v1848_v57  ;;  %v1821_v41 = vadd.f32 %v1820_v62, %v1792_v45  ;;  %2133 = vmatpush.bf16.msra.mxu0 %v2839_v54  ;;  %v2964_v57 = vld [vmem:[#allocation5 + $0x458] sm:$0xf0]  ;;  %v1655_v23 = vadd.f32 %v3817_v34, %v3894_v61  ;;  %v3401_v45 = vld [vmem:[#allocation5 + $0x52c] sm:$0xf] }
 0x17b   :  { %v2967_v58 = vor.u32 %v3373_v47, %v2964_v57  ;;  %v3076_v62 = vld [vmem:[#allocation5 + $0x538] sm:$0xf0] }
 0x17c   :  { %2249 = vst [vmem:[#allocation8 + $0x28] sm:$0xff] %v1821_v41  ;;  %v1684_v17 = vadd.f32 %v3877_v39, %v1655_v23  ;;  %v3079_v34 = vor.u32 %v3401_v45, %v3076_v62  ;;  %v2932_v47 = vld [vmem:[#allocation5 + $0x418] sm:$0xf0] }
 0x17d   :  { %2162 = vmatpush.bf16.msra.mxu1 %v2967_v58 }
 0x17e   :  { %v1849_v21 = vpop.f32.mrf.mxu2  ;;  %2192 = vmatpush.bf16.msra.mxu2 %v3079_v34  ;;  %2134 = vmatpush.bf16.msra.mxu0 %v2823_v56 }
 0x17f   :  { %v1850_v19 = vadd.f32 %v1849_v21, %v3938_v37  ;;  %v1794_v28 = vpop.f32.mrf.mxu0  ;;  %v3397_v21 = vld [vmem:[#allocation5 + $0x50c] sm:$0xf] }
 0x180   :  { %v1795_v55 = vadd.f32 %v1794_v28, %v1766_v12  ;;  %v1686_v12 = vadd.f32 %v3889_v36, %v1657_v27  ;;  %v4231_v27 = vld [vmem:[#allocation20_spill] sm:$0xff] }
 0x181   :  { %v1878_v5 = vpop.f32.mrf.mxu3  ;;  %v1823_v11 = vpop.f32.mrf.mxu1  ;;  %2163 = vmatpush.bf16.msra.mxu1 %v2951_v8 }
 0x182   :  { %v3954_v53 = vadd.f32 %v1878_v5, %v1850_v19  ;;  %v1824_v29 = vadd.f32 %v1823_v11, %v1795_v55  ;;  %3201 = vmatmul.msk.bf16.gmra.mxu0 %vm1419_vm0, %v3647_v20  ;;  %v3333_v19 = vld [vmem:[#allocation5 + $0x30c] sm:$0xf]  ;;  %v2804_v5 = vld [vmem:[#allocation5 + $0x318] sm:$0xf0]  ;;  %v1715_v36 = vadd.f32 %v3891_v43, %v1686_v12 }
 0x183   :  { %2083 = vmatmul.bf16.gmra.mxu2 %v3598_v35  ;;  %v1713_v35 = vadd.f32 %v3879_v22, %v1684_v17  ;;  %v3060_v22 = vld [vmem:[#allocation5 + $0x518] sm:$0xf0]  ;;  %v2807_v55 = vor.u32 %v3333_v19, %v2804_v5  ;;  %v3365_v11 = vld [vmem:[#allocation5 + $0x40c] sm:$0xf] }
 0x184   :  { %2054 = vmatmul.bf16.gmra.mxu1 %v3596_v31  ;;  %2253 = vst [vmem:[#allocation8 + $0x48] sm:$0xff] %v1824_v29  ;;  %v3063_v54 = vor.u32 %v3397_v21, %v3060_v22  ;;  %v2935_v23 = vor.u32 %v3365_v11, %v2932_v47  ;;  %v1744_v17 = vadd.f32 %v3896_v46, %v1715_v36 }
 0x185   :  { %v1742_v6 = vadd.f32 %v3885_v1, %v1713_v35  ;;  %2135 = vmatpush.bf16.msra.mxu0 %v2807_v55  ;;  %v4227_v35 = vld [vmem:[#allocation14_spill] sm:$0xff] }
 0x186   :  { %2112 = vmatmul.bf16.gmra.mxu3 %v4215_v25  ;;  %v1852_v14 = vpop.f32.mrf.mxu2  ;;  %2193 = vmatpush.bf16.msra.mxu2 %v3063_v54  ;;  %v1773_v62 = vadd.f32 %v3898_v63, %v1744_v17 }
 0x187   :  { %v1853_v41 = vadd.f32 %v1852_v14, %v3938_v37  ;;  %v1796_v48 = vpop.f32.mrf.mxu0  ;;  %v1771_v28 = vadd.f32 %v3887_v30, %v1742_v6  ;;  %2164 = vmatpush.bf16.msra.mxu1 %v2935_v23  ;;  %v1660_v30 = vadd.f32 %v3833_v50, %v3894_v61 }
 0x188   :  { %v1797_v39 = vadd.f32 %v1796_v48, %v1768_v0 }
 0x189   :  { %v1881_v31 = vpop.f32.mrf.mxu3  ;;  %v1825_v13 = vpop.f32.mrf.mxu1  ;;  %v1689_v43 = vadd.f32 %v3900_v40, %v1660_v30 }
 0x18a   :  { %v3968_v25 = vadd.f32 %v1881_v31, %v1853_v41  ;;  %v1826_v7 = vadd.f32 %v1825_v13, %v1797_v39 }
 0x18b   :  { %v1718_v9 = vadd.f32 %v3902_v51, %v1689_v43  ;;  %v4236_v43 = vld [vmem:[#allocation24_spill] sm:$0xff] }
 0x18c   :  { %2257 = vst [vmem:[#allocation8 + $0x68] sm:$0xff] %v1826_v7 }
 0x18e   :  { %v1854_v10 = vpop.f32.mrf.mxu2 }
 0x18f   :  { %v1855_v18 = vadd.f32 %v1854_v10, %v3938_v37  ;;  %v1799_v57 = vpop.f32.mrf.mxu0 }
 0x190   :  { %v1800_v32 = vadd.f32 %v1799_v57, %v1771_v28 }
 0x191   :  { %v1883_v1 = vpop.f32.mrf.mxu3  ;;  %v1828_v29 = vpop.f32.mrf.mxu1 }
 0x192   :  { %v3977_v58 = vadd.f32 %v1883_v1, %v1855_v18  ;;  %v1829_v45 = vadd.f32 %v1828_v29, %v1800_v32  ;;  %3202 = vmatmul.msk.bf16.gmra.mxu0 %vm1419_vm0, %v3658_v4  ;;  %v4233_v18 = vld [vmem:[#allocation22_spill] sm:$0xff]  ;;  %v4234_v1 = vld [vmem:[#allocation23_spill] sm:$0xff] }
 0x193   :  { %2088 = vmatmul.bf16.gmra.mxu2 %v3610_v16  ;;  %v1747_v16 = vadd.f32 %v3911_v60, %v1718_v9 }
 0x194   :  { %2059 = vmatmul.bf16.gmra.mxu1 %v3608_v15  ;;  %2261 = vst [vmem:[#allocation8 + $0x88] sm:$0xff] %v1829_v45  ;;  %v1662_v15 = vadd.f32 %v3835_v44, %v3894_v61  ;;  %v4228_v61 = vld [vmem:[#allocation30_spill] sm:$0xff]  ;;  %v4235_v45 = vld [vmem:[#allocation15_spill] sm:$0xff] }
 0x195   :  { %v1776_v63 = vadd.f32 %v3913_v59, %v1747_v16  ;;  %v4230_v59 = vld [vmem:[#allocation19_spill] sm:$0xff]  ;;  %v4239_v16 = vld [vmem:[#allocation26_spill] sm:$0xff] }
 0x196   :  { %2117 = vmatmul.bf16.gmra.mxu3 %v4218_v2  ;;  %v1857_v34 = vpop.f32.mrf.mxu2  ;;  %v1691_v2 = vadd.f32 %v3915_v3, %v1662_v15  ;;  %v4229_v3 = vld [vmem:[#allocation18_spill] sm:$0xff]  ;;  %v4238_v15 = vld [vmem:[#allocation17_spill] sm:$0xff] }
 0x197   :  { %v1858_v50 = vadd.f32 %v1857_v34, %v3938_v37  ;;  %v1801_v46 = vpop.f32.mrf.mxu0 }
 0x198   :  { %v1802_v0 = vadd.f32 %v1801_v46, %v1773_v62  ;;  %v1720_v39 = vadd.f32 %v4227_v35, %v1691_v2  ;;  %v4237_v62 = vld [vmem:[#allocation25_spill] sm:$0xff] }
 0x199   :  { %v1886_v33 = vpop.f32.mrf.mxu3  ;;  %v1830_v14 = vpop.f32.mrf.mxu1 }
 0x19a   :  { %v3991_v56 = vadd.f32 %v1886_v33, %v1858_v50  ;;  %v1831_v40 = vadd.f32 %v1830_v14, %v1802_v0  ;;  %v1749_v44 = vadd.f32 %v3925_v42, %v1720_v39  ;;  %v4241_v39 = vld [vmem:[#allocation21_spill] sm:$0xff] }
 0x19c   :  { %2265 = vst [vmem:[#allocation8 + $0xa8] sm:$0xff] %v1831_v40  ;;  %v1778_v6 = vadd.f32 %v3927_v49, %v1749_v44  ;;  %v4232_v49 = vld [vmem:[#allocation13_spill] sm:$0xff]  ;;  %v4240_v40 = vld [vmem:[#allocation27_spill] sm:$0xff] }
 0x19e   :  { %v1859_v41 = vpop.f32.mrf.mxu2 }
 0x19f   :  { %v1860_v31 = vadd.f32 %v1859_v41, %v3938_v37  ;;  %v1804_v51 = vpop.f32.mrf.mxu0 }
 0x1a0   :  { %v1805_v13 = vadd.f32 %v1804_v51, %v1776_v63 }
 0x1a1   :  { %v1888_v48 = vpop.f32.mrf.mxu3  ;;  %v1833_v24 = vpop.f32.mrf.mxu1 }
 0x1a2   :  { %v4000_v26 = vadd.f32 %v1888_v48, %v1860_v31  ;;  %v1834_v60 = vadd.f32 %v1833_v24, %v1805_v13  ;;  %3203 = vmatmul.msk.bf16.gmra.mxu0 %vm1419_vm0, %v4228_v61  ;;  %v4242_v13 = vld [vmem:[#allocation28_spill] sm:$0xff]  ;;  %v4243_v24 = vld [vmem:[#allocation29_spill] sm:$0xff] }
 0x1a3   :  { %2093 = vmatmul.bf16.gmra.mxu2 %v4230_v59 }
 0x1a4   :  { %2064 = vmatmul.bf16.gmra.mxu1 %v4229_v3  ;;  %2269 = vst [vmem:[#allocation8 + $0xc8] sm:$0xff] %v1834_v60 }
 0x1a6   :  { %2122 = vmatmul.bf16.gmra.mxu3 %v4231_v27  ;;  %v1862_v7 = vpop.f32.mrf.mxu2 }
 0x1a7   :  { %v1863_v8 = vadd.f32 %v1862_v7, %v3938_v37  ;;  %v1806_v21 = vpop.f32.mrf.mxu0 }
 0x1a8   :  { %v1807_v22 = vadd.f32 %v1806_v21, %v1778_v6 }
 0x1a9   :  { %v1891_v12 = vpop.f32.mrf.mxu3  ;;  %v1835_v42 = vpop.f32.mrf.mxu1 }
 0x1aa   :  { %v4010_v54 = vadd.f32 %v1891_v12, %v1863_v8  ;;  %v1836_v19 = vadd.f32 %v1835_v42, %v1807_v22 }
 0x1ac   :  { %2273 = vst [vmem:[#allocation8 + $0xe8] sm:$0xff] %v1836_v19 }
 0x1ae   :  { %v1864_v5 = vpop.f32.mrf.mxu2 }
 0x1af   :  { %v1865_v28 = vadd.f32 %v1864_v5, %v3938_v37  ;;  %v1905_v55 = vpop.f32.mrf.mxu0 }
 0x1b1   :  { %v1893_v10 = vpop.f32.mrf.mxu3  ;;  %v1934_v11 = vpop.f32.mrf.mxu1 }
 0x1b2   :  { %v4013_v47 = vadd.f32 %v1893_v10, %v1865_v28  ;;  %2136 = vmatmul.bf16.vlgmr.msra.gmra.mxu0 %v4232_v49 }
 0x1b3   :  { %2194 = vmatmul.bf16.vlgmr.msra.gmra.mxu2 %v4234_v1 }
 0x1b4   :  { %2165 = vmatmul.bf16.vlgmr.msra.gmra.mxu1 %v4233_v18 }
 0x1b6   :  { %3204 = vmatmul.msk.bf16.vlgmr.msra.gmra.mxu3 %vm1419_vm0, %v3636_v38  ;;  %v1963_v57 = vpop.f32.mrf.mxu2 }
 0x1b7   :  { %v1907_v36 = vpop.f32.mrf.mxu0 }
 0x1b8   :  { %v1908_v7 = vadd.f32 %v1907_v36, %v3954_v53 }
 0x1b9   :  { %v1992_v23 = vpop.f32.mrf.mxu3  ;;  %v1936_v32 = vpop.f32.mrf.mxu1 }
 0x1ba   :  { %v1937_v22 = vadd.f32 %v1936_v32, %v1908_v7 }
 0x1be   :  { %v1965_v29 = vpop.f32.mrf.mxu2 }
 0x1bf   :  { %v1910_v30 = vpop.f32.mrf.mxu0  ;;  %v1966_v19 = vadd.f32 %v1965_v29, %v1937_v22 }
 0x1c0   :  { %v1911_v5 = vadd.f32 %v1910_v30, %v3968_v25 }
 0x1c1   :  { %v1994_v37 = vpop.f32.mrf.mxu3  ;;  %v1939_v17 = vpop.f32.mrf.mxu1 }
 0x1c2   :  { %2141 = vmatmul.bf16.gmra.mxu0 %v4235_v45  ;;  %v1995_v28 = vadd.f32 %v1994_v37, %v1966_v19 }
 0x1c3   :  { %2199 = vmatmul.bf16.gmra.mxu2 %v4237_v62 }
 0x1c4   :  { %2170 = vmatmul.bf16.gmra.mxu1 %v4236_v43 }
 0x1c6   :  { %3205 = vmatmul.msk.bf16.gmra.mxu3 %vm1419_vm0, %v3647_v20  ;;  %v1968_v34 = vpop.f32.mrf.mxu2 }
 0x1c7   :  { %v1912_v38 = vpop.f32.mrf.mxu0 }
 0x1c9   :  { %v1997_v50 = vpop.f32.mrf.mxu3  ;;  %v1941_v33 = vpop.f32.mrf.mxu1 }
 0x1ce   :  { %v1970_v46 = vpop.f32.mrf.mxu2 }
 0x1cf   :  { %v1915_v0 = vpop.f32.mrf.mxu0 }
 0x1d1   :  { %v1999_v9 = vpop.f32.mrf.mxu3  ;;  %v1944_v14 = vpop.f32.mrf.mxu1 }
 0x1d2   :  { %2146 = vmatmul.bf16.gmra.mxu0 %v4238_v15 }
 0x1d3   :  { %2204 = vmatmul.bf16.gmra.mxu2 %v4240_v40 }
 0x1d4   :  { %2175 = vmatmul.bf16.gmra.mxu1 %v4239_v16 }
 0x1d6   :  { %3206 = vmatmul.msk.bf16.gmra.mxu3 %vm1419_vm0, %v3658_v4  ;;  %v1973_v2 = vpop.f32.mrf.mxu2  ;;  %v1906_v4 = vadd.f32 %v1905_v55, %v3945_v52 }
 0x1d7   :  { %v1917_v20 = vpop.f32.mrf.mxu0 }
 0x1d8   :  { %v1935_v59 = vadd.f32 %v1934_v11, %v1906_v4  ;;  %v1940_v11 = vadd.f32 %v1939_v17, %v1911_v5  ;;  %v1916_v17 = vadd.f32 %v1915_v0, %v3991_v56 }
 0x1d9   :  { %v2002_v63 = vpop.f32.mrf.mxu3  ;;  %v1946_v41 = vpop.f32.mrf.mxu1 }
 0x1da   :  { %v1964_v6 = vadd.f32 %v1963_v57, %v1935_v59  ;;  %v1969_v1 = vadd.f32 %v1968_v34, %v1940_v11  ;;  %v1913_v57 = vadd.f32 %v1912_v38, %v3977_v58 }
 0x1dc   :  { %v1993_v8 = vadd.f32 %v1992_v23, %v1964_v6  ;;  %v1998_v23 = vadd.f32 %v1997_v50, %v1969_v1  ;;  %v1942_v29 = vadd.f32 %v1941_v33, %v1913_v57  ;;  %v1945_v50 = vadd.f32 %v1944_v14, %v1916_v17 }
 0x1dd   :  { %v1918_v33 = vadd.f32 %v1917_v20, %v4000_v26 }
 0x1de   :  { %v4030_v31 = vpop.f32.mrf.mxu2  ;;  %v1971_v45 = vadd.f32 %v1970_v46, %v1942_v29  ;;  %v1974_v16 = vadd.f32 %v1973_v2, %v1945_v50 }
 0x1df   :  { %v4034_v51 = vpop.f32.mrf.mxu0 }
 0x1e0   :  { %v2000_v43 = vadd.f32 %v1999_v9, %v1971_v45  ;;  %v2003_v40 = vadd.f32 %v2002_v63, %v1974_v16  ;;  %v1947_v9 = vadd.f32 %v1946_v41, %v1918_v33  ;;  %v1921_v14 = vadd.f32 %v4034_v51, %v4010_v54 }
 0x1e1   :  { %v4032_v48 = vpop.f32.mrf.mxu3  ;;  %v4036_v35 = vpop.f32.mrf.mxu1 }
 0x1e2   :  { %2151 = vmatmul.bf16.gmra.mxu0 %v4241_v39  ;;  %v1950_v20 = vadd.f32 %v4036_v35, %v1921_v14 }
 0x1e3   :  { %2209 = vmatmul.bf16.gmra.mxu2 %v4243_v24  ;;  %v1976_v24 = vadd.f32 %v4030_v31, %v1947_v9 }
 0x1e4   :  { %2180 = vmatmul.bf16.gmra.mxu1 %v4242_v13 }
 0x1e5   :  { %v2005_v2 = vadd.f32 %v4032_v48, %v1976_v24 }
 0x1e6   :  { %3207 = vmatmul.msk.bf16.gmra.mxu3 %vm1419_vm0, %v4228_v61  ;;  %v4044_v44 = vpop.f32.mrf.mxu2 }
 0x1e7   :  { %v4048_v3 = vpop.f32.mrf.mxu0  ;;  %v1979_v6 = vadd.f32 %v4044_v44, %v1950_v20  ;;  %v3442_v44 = vld [vmem:[#allocation7] sm:$0xf] }
 0x1e8   :  { %v1923_v31 = vadd.f32 %v4048_v3, %v4013_v47 }
 0x1e9   :  { %v4046_v60 = vpop.f32.mrf.mxu3  ;;  %v4050_v27 = vpop.f32.mrf.mxu1 }
 0x1ea   :  { %v2008_v54 = vadd.f32 %v4046_v60, %v1979_v6 }
 0x1ee   :  { %v4053_v12 = vpop.f32.mrf.mxu2 }
 0x1ef   :  { %v2021_v52 = vpop.f32.mrf.mxu0 }
 0x1f0   :  { %v2022_v61 = vadd.f32 %v2021_v52, %v1993_v8  ;;  %v1952_v8 = vadd.f32 %v4050_v27, %v1923_v31 }
 0x1f1   :  { %v4055_v21 = vpop.f32.mrf.mxu3  ;;  %v4057_v42 = vpop.f32.mrf.mxu1 }
 0x1f2   :  { %2246 = vst [vmem:[#allocation8 + $0x10] sm:$0xff] %v2022_v61  ;;  %v1981_v22 = vadd.f32 %v4053_v12, %v1952_v8  ;;  %v4110_v61 = vperm.slane %v3442_v44, 3 }
 0x1f4   :  { %v2010_v47 = vadd.f32 %v4055_v21, %v1981_v22  ;;  %v2051_v60 = vadd.f32 %v4057_v42, %v4110_v61 }
 0x1f6   :  { %v4060_v10 = vpop.f32.mrf.mxu2 }
 0x1f7   :  { %v2023_v53 = vpop.f32.mrf.mxu0  ;;  %v2080_v12 = vadd.f32 %v4060_v10, %v2051_v60 }
 0x1f8   :  { %v2024_v49 = vadd.f32 %v2023_v53, %v1995_v28 }
 0x1f9   :  { %v4062_v55 = vpop.f32.mrf.mxu3  ;;  %v4064_v18 = vpop.f32.mrf.mxu1 }
 0x1fa   :  { %2250 = vst [vmem:[#allocation8 + $0x30] sm:$0xff] %v2024_v49  ;;  %v2109_v11 = vadd.f32 %v4062_v55, %v2080_v12  ;;  %v2053_v42 = vadd.f32 %v4064_v18, %v4110_v61 }
 0x1fe   :  { %v4067_v36 = vpop.f32.mrf.mxu2 }
 0x1ff   :  { %v2026_v25 = vpop.f32.mrf.mxu0 }
 0x200   :  { %v2027_v37 = vadd.f32 %v2026_v25, %v1998_v23  ;;  %v2082_v23 = vadd.f32 %v4067_v36, %v2053_v42 }
 0x201   :  { %v4069_v32 = vpop.f32.mrf.mxu3  ;;  %v4071_v30 = vpop.f32.mrf.mxu1 }
 0x202   :  { %2254 = vst [vmem:[#allocation8 + $0x50] sm:$0xff] %v2027_v37  ;;  %v2111_v37 = vadd.f32 %v4069_v32, %v2082_v23  ;;  %v2056_v10 = vadd.f32 %v4071_v30, %v4110_v61 }
 0x206   :  { %v4074_v62 = vpop.f32.mrf.mxu2 }
 0x207   :  { %v2028_v58 = vpop.f32.mrf.mxu0 }
 0x208   :  { %v2029_v38 = vadd.f32 %v2028_v58, %v2000_v43 }
 0x209   :  { %v4076_v34 = vpop.f32.mrf.mxu3  ;;  %v4078_v15 = vpop.f32.mrf.mxu1 }
 0x20a   :  { %2258 = vst [vmem:[#allocation8 + $0x70] sm:$0xff] %v2029_v38  ;;  %v2085_v38 = vadd.f32 %v4074_v62, %v2056_v10  ;;  %v2058_v30 = vadd.f32 %v4078_v15, %v4110_v61 }
 0x20c   :  { %v2114_v36 = vadd.f32 %v4076_v34, %v2085_v38 }
 0x20e   :  { %v4081_v39 = vpop.f32.mrf.mxu2 }
 0x20f   :  { %v2031_v56 = vpop.f32.mrf.mxu0  ;;  %v2087_v24 = vadd.f32 %v4081_v39, %v2058_v30 }
 0x210   :  { %v2032_v0 = vadd.f32 %v2031_v56, %v2003_v40 }
 0x211   :  { %v4083_v46 = vpop.f32.mrf.mxu3  ;;  %v4085_v13 = vpop.f32.mrf.mxu1 }
 0x212   :  { %2262 = vst [vmem:[#allocation8 + $0x90] sm:$0xff] %v2032_v0  ;;  %v2116_v62 = vadd.f32 %v4083_v46, %v2087_v24 }
 0x216   :  { %v4091_v4 = vpop.f32.mrf.mxu2 }
 0x217   :  { %v2033_v63 = vpop.f32.mrf.mxu0 }
 0x218   :  { %v2034_v59 = vadd.f32 %v2033_v63, %v2005_v2  ;;  %v2061_v63 = vadd.f32 %v4085_v13, %v4110_v61 }
 0x219   :  { %v4093_v26 = vpop.f32.mrf.mxu3  ;;  %v4096_v41 = vpop.f32.mrf.mxu1 }
 0x21a   :  { %2266 = vst [vmem:[#allocation8 + $0xb0] sm:$0xff] %v2034_v59  ;;  %v2090_v15 = vadd.f32 %v4091_v4, %v2061_v63  ;;  %v2063_v13 = vadd.f32 %v4096_v41, %v4110_v61 }
 0x21c   :  { %v2119_v39 = vadd.f32 %v4093_v26, %v2090_v15 }
 0x21e   :  { %v4102_v51 = vpop.f32.mrf.mxu2 }
 0x21f   :  { %v2036_v7 = vpop.f32.mrf.mxu0 }
 0x220   :  { %v2037_v52 = vadd.f32 %v2036_v7, %v2008_v54 }
 0x221   :  { %v4104_v48 = vpop.f32.mrf.mxu3  ;;  %v4107_v35 = vpop.f32.mrf.mxu1 }
 0x222   :  { %2270 = vst [vmem:[#allocation8 + $0xd0] sm:$0xff] %v2037_v52 }
 0x226   :  { %v4113_v3 = vpop.f32.mrf.mxu2 }
 0x227   :  { %v2038_v5 = vpop.f32.mrf.mxu0 }
 0x228   :  { %v2039_v27 = vadd.f32 %v2038_v5, %v2010_v47  ;;  %v2092_v5 = vadd.f32 %v4102_v51, %v2063_v13 }
 0x229   :  { %v4117_v19 = vpop.f32.mrf.mxu3  ;;  %v4119_v28 = vpop.f32.mrf.mxu1 }
 0x22a   :  { %2274 = vst [vmem:[#allocation8 + $0xf0] sm:$0xff] %v2039_v27  ;;  %v2121_v4 = vadd.f32 %v4104_v48, %v2092_v5  ;;  %v2068_v48 = vadd.f32 %v4119_v28, %v4110_v61 }
 0x22e   :  { %v4122_v53 = vpop.f32.mrf.mxu2 }
 0x22f   :  { %v2137_v21 = vpop.f32.mrf.mxu0 }
 0x230   :  { %v2138_v57 = vadd.f32 %v2137_v21, %v2109_v11  ;;  %v2066_v11 = vadd.f32 %v4107_v35, %v4110_v61 }
 0x231   :  { %v4125_v49 = vpop.f32.mrf.mxu3  ;;  %v2166_v1 = vpop.f32.mrf.mxu1 }
 0x232   :  { %v2167_v25 = vadd.f32 %v2166_v1, %v2138_v57  ;;  %v2095_v41 = vadd.f32 %v4113_v3, %v2066_v11 }
 0x234   :  { %v2124_v51 = vadd.f32 %v4117_v19, %v2095_v41 }
 0x236   :  { %v2195_v29 = vpop.f32.mrf.mxu2 }
 0x237   :  { %v2196_v45 = vadd.f32 %v2195_v29, %v2167_v25  ;;  %v2139_v55 = vpop.f32.mrf.mxu0 }
 0x238   :  { %v2140_v50 = vadd.f32 %v2139_v55, %v2111_v37 }
 0x239   :  { %v2224_v17 = vpop.f32.mrf.mxu3  ;;  %v2168_v43 = vpop.f32.mrf.mxu1 }
 0x23a   :  { %v2225_v58 = vadd.f32 %v2224_v17, %v2196_v45  ;;  %v2169_v18 = vadd.f32 %v2168_v43, %v2140_v50  ;;  %v2097_v43 = vadd.f32 %v4122_v53, %v2068_v48 }
 0x23c   :  { %2247 = vst [vmem:[#allocation8 + $0x18] sm:$0xff] %v2225_v58  ;;  %v2126_v3 = vadd.f32 %v4125_v49, %v2097_v43 }
 0x23e   :  { %v2197_v16 = vpop.f32.mrf.mxu2 }
 0x23f   :  { %v2198_v33 = vadd.f32 %v2197_v16, %v2169_v18  ;;  %v2142_v56 = vpop.f32.mrf.mxu0 }
 0x240   :  { %v2143_v0 = vadd.f32 %v2142_v56, %v2114_v36 }
 0x241   :  { %v2226_v40 = vpop.f32.mrf.mxu3  ;;  %v2171_v32 = vpop.f32.mrf.mxu1 }
 0x242   :  { %v2227_v9 = vadd.f32 %v2226_v40, %v2198_v33  ;;  %v2172_v14 = vadd.f32 %v2171_v32, %v2143_v0 }
 0x244   :  { %2251 = vst [vmem:[#allocation8 + $0x38] sm:$0xff] %v2227_v9 }
 0x246   :  { %v2200_v2 = vpop.f32.mrf.mxu2 }
 0x247   :  { %v2201_v34 = vadd.f32 %v2200_v2, %v2172_v14  ;;  %v2144_v59 = vpop.f32.mrf.mxu0 }
 0x248   :  { %v2145_v54 = vadd.f32 %v2144_v59, %v2116_v62 }
 0x249   :  { %v2229_v20 = vpop.f32.mrf.mxu3  ;;  %v2173_v6 = vpop.f32.mrf.mxu1 }
 0x24a   :  { %v2230_v31 = vadd.f32 %v2229_v20, %v2201_v34  ;;  %v2174_v7 = vadd.f32 %v2173_v6, %v2145_v54 }
 0x24c   :  { %2255 = vst [vmem:[#allocation8 + $0x58] sm:$0xff] %v2230_v31 }
 0x24e   :  { %v2202_v8 = vpop.f32.mrf.mxu2 }
 0x24f   :  { %v2203_v52 = vadd.f32 %v2202_v8, %v2174_v7  ;;  %v2147_v44 = vpop.f32.mrf.mxu0 }
 0x250   :  { %v2148_v60 = vadd.f32 %v2147_v44, %v2119_v39 }
 0x251   :  { %v2231_v22 = vpop.f32.mrf.mxu3  ;;  %v2176_v46 = vpop.f32.mrf.mxu1 }
 0x252   :  { %v2232_v47 = vadd.f32 %v2231_v22, %v2203_v52  ;;  %v2177_v27 = vadd.f32 %v2176_v46, %v2148_v60 }
 0x254   :  { %2259 = vst [vmem:[#allocation8 + $0x78] sm:$0xff] %v2232_v47 }
 0x256   :  { %v2205_v12 = vpop.f32.mrf.mxu2 }
 0x257   :  { %v2206_v26 = vadd.f32 %v2205_v12, %v2177_v27  ;;  %v2149_v1 = vpop.f32.mrf.mxu0 }
 0x258   :  { %v2150_v23 = vadd.f32 %v2149_v1, %v2121_v4 }
 0x259   :  { %v2234_v21 = vpop.f32.mrf.mxu3  ;;  %v2178_v42 = vpop.f32.mrf.mxu1 }
 0x25a   :  { %v2235_v57 = vadd.f32 %v2234_v21, %v2206_v26  ;;  %v2179_v25 = vadd.f32 %v2178_v42, %v2150_v23 }
 0x25c   :  { %2263 = vst [vmem:[#allocation8 + $0x98] sm:$0xff] %v2235_v57 }
 0x25e   :  { %v2207_v29 = vpop.f32.mrf.mxu2 }
 0x25f   :  { %v2208_v37 = vadd.f32 %v2207_v29, %v2179_v25  ;;  %v2152_v45 = vpop.f32.mrf.mxu0 }
 0x260   :  { %v2153_v17 = vadd.f32 %v2152_v45, %v2124_v51 }
 0x261   :  { %v2236_v10 = vpop.f32.mrf.mxu3  ;;  %v2181_v55 = vpop.f32.mrf.mxu1 }
 0x262   :  { %v2237_v35 = vadd.f32 %v2236_v10, %v2208_v37  ;;  %v2182_v58 = vadd.f32 %v2181_v55, %v2153_v17 }
 0x264   :  { %2267 = vst [vmem:[#allocation8 + $0xb8] sm:$0xff] %v2237_v35 }
 0x266   :  { %v2210_v50 = vpop.f32.mrf.mxu2 }
 0x267   :  { %v2211_v38 = vadd.f32 %v2210_v50, %v2182_v58  ;;  %v2154_v16 = vpop.f32.mrf.mxu0 }
 0x268   :  { %v2155_v36 = vadd.f32 %v2154_v16, %v2126_v3 }
 0x269   :  { %v2239_v18 = vpop.f32.mrf.mxu3  ;;  %v2183_v33 = vpop.f32.mrf.mxu1 }
 0x26a   :  { %v2240_v19 = vadd.f32 %v2239_v18, %v2211_v38  ;;  %v2184_v40 = vadd.f32 %v2183_v33, %v2155_v36 }
 0x26c   :  { %2271 = vst [vmem:[#allocation8 + $0xd8] sm:$0xff] %v2240_v19 }
 0x26e   :  { %v2212_v61 = vpop.f32.mrf.mxu2 }
 0x26f   :  { %v2213_v28 = vadd.f32 %v2212_v61, %v2184_v40 }
 0x271   :  { %v2241_v53 = vpop.f32.mrf.mxu3 }
 0x272   :  { %v2242_v49 = vadd.f32 %v2241_v53, %v2213_v28 }
 0x274   :  { %2275 = vst [vmem:[#allocation8 + $0xf8] sm:$0xff] %v2242_v49 }
 0x275   :  { %2288 = dma.vmem_to_hbm [thread:$0]  %s2281_s2, 4096, %s2283_s5, [#allocation4], %s3553_s6, %s3553_s6, %s3554_s7  }
 0x276   :  { %3543 = dma.done.wait [#allocation4], 4096  }
 0x277   :  { %3544 = vsyncadd [#allocation4], 4294963200 }
 0x278   :  { %2293 = vsyncpa [#allocation3], 1 }
 0x279   :  { %2294 = vsyncpa [#allocation6], 1 }
 0x27a   :  { %2295 = vsyncpa [#allocation4], 1 }

</bundles_post_ra>
